<compile_context>
chip_gen: v5e
topology: v5e:2x2
jax: 0.10.0
libtpu: 0.0.40
codegen_flags: <defaults>
</compile_context>

<pallas_src>
import functools

import jax
import jax.numpy as jnp
from jax import lax
from jax.experimental import pallas as pl
from jax.experimental.pallas import tpu as pltpu

N_GROUPS = 10  # the PyTorch forward hard-codes a 10-way split (i in 0..8, j in i+1..9)


def _round_up(x, m):
    return ((x + m - 1) // m) * m


def hsic_partial_kernel(fr_ref, w_ref, gram_ref, sum_ref, *, n, row_tile,
                        tiles_per_slice, ragged, compute_dtype, precision):
    """Accumulate partial A^T A and column sums of A for one row slice.

    fr_ref  : (row_tile, D) feature block, native dtype
    w_ref   : (row_tile, 1) weight block, native dtype
    gram_ref: (D, D) f32 resident output block (partial A^T A for this slice)
    sum_ref : (1, D) f32 resident output block (partial column sums of A)
    """
    k = pl.program_id(1)

    @pl.when(k == 0)
    def _init():
        gram_ref[...] = jnp.zeros_like(gram_ref)
        sum_ref[...] = jnp.zeros_like(sum_ref)

    w = w_ref[...].astype(jnp.float32)
    a = fr_ref[...].astype(jnp.float32) * (w * w)        # A = diag(s) F, s = w*w

    if ragged:
        # Mask rows past the true n: the last (and any phantom, clamped) tile
        # holds garbage past the edge. jnp.where is a select, so NaN-safe;
        # cost is a few VPU ops on one tile.
        tile_idx = pl.program_id(0) * tiles_per_slice + k
        rows = tile_idx * row_tile + lax.broadcasted_iota(
            jnp.int32, (row_tile, 1), 0)
        a = jnp.where(rows < n, a, jnp.float32(0.0))

    a_mm = a if compute_dtype is None else a.astype(compute_dtype)
    # A^T A: contraction over the sample (row) axis -> (D, D); long-K MXU shape.
    # TODO(synk): verify with pl.lower_as_mlir that no per-step XLU transpose of
    # the (row_tile, D) operand is emitted; restage as (D,row_tile)x(row_tile,D)
    # if it is.
    gram_ref[...] += lax.dot_general(
        a_mm, a_mm, (((0,), (0,)), ((), ())),
        preferred_element_type=jnp.float32, precision=precision)
    sum_ref[...] += jnp.sum(a, axis=0, keepdims=True)


def hsic_weight_forward(final_readout, weight, embedding_size, *, row_tile=None,
                        matmul_dtype=None, matmul_precision=None):
    """Pallas implementation of HSIC_weight.forward(). Returns shape (1,) float32.

    Inputs are streamed in their native dtype (no wrapper upcast, no padding copy).
    matmul_dtype=jnp.bfloat16 enables the bf16 MXU fast path (f32 accumulation);
    validate numerically before using it.
    """
    n = final_readout.shape[0]
    d = N_GROUPS * embedding_size
    assert final_readout.shape == (n, d)
    assert weight.shape == (n, 1)
    # Note (design-level): choosing embedding_size so D = 10*emb is a multiple of
    # 128 improves MXU/lane utilization; D = 160 pads to 256 lanes.

    if row_tile is None:
        row_tile = _round_up(n, 8) if n <= 1024 else 1024
    row_tile = max(8, _round_up(row_tile, 8))

    total_tiles = -(-n // row_tile)
    num_slices = 2 if total_tiles >= 2 else 1          # leading "parallel" axis: lets
    tiles_per_slice = -(-total_tiles // num_slices)    # v7x megacore split the rows.
    ragged = (n % row_tile != 0) or (num_slices * tiles_per_slice != total_tiles)
    last_tile = total_tiles - 1

    if matmul_precision is None:
        matmul_precision = (lax.Precision.DEFAULT if matmul_dtype is not None
                            else lax.Precision.HIGHEST)

    def fr_map(c, k):
        return (jnp.minimum(c * tiles_per_slice + k, last_tile), 0)

    def w_map(c, k):
        return (jnp.minimum(c * tiles_per_slice + k, last_tile), 0)

    fr_item = jnp.dtype(final_readout.dtype).itemsize
    w_item = jnp.dtype(weight.dtype).itemsize
    vmem_est = (2 * row_tile * d * fr_item             # double-buffered feature block
                + 2 * row_tile * w_item                # double-buffered weight block
                + d * d * 4 + d * 4                    # resident output accumulators
                + 3 * row_tile * d * 4)                # in-kernel f32 temporaries
    vmem_limit = int(min(max(2 * vmem_est, 32 * 1024 * 1024), 60 * 1024 * 1024))

    kernel = functools.partial(
        hsic_partial_kernel, n=n, row_tile=row_tile,
        tiles_per_slice=tiles_per_slice, ragged=ragged,
        compute_dtype=matmul_dtype, precision=matmul_precision)

    partial_gram, partial_sum = pl.pallas_call(
        kernel,
        out_shape=(jax.ShapeDtypeStruct((num_slices, d, d), jnp.float32),
                   jax.ShapeDtypeStruct((num_slices, 1, d), jnp.float32)),
        grid_spec=pltpu.PrefetchScalarGridSpec(
            num_scalar_prefetch=0,
            grid=(num_slices, tiles_per_slice),
            in_specs=[
                pl.BlockSpec((row_tile, d), fr_map),
                pl.BlockSpec((row_tile, 1), w_map),
            ],
            out_specs=[
                pl.BlockSpec((None, d, d), lambda c, k: (c, 0, 0)),
                pl.BlockSpec((None, 1, d), lambda c, k: (c, 0, 0)),
            ],
        ),
        compiler_params=pltpu.CompilerParams(
            dimension_semantics=("parallel", "arbitrary"),
            vmem_limit_bytes=vmem_limit,
        ),
    )(final_readout, weight)

    # Slim O(D^2) finalize outside the kernel (plain XLA): centering + off-diagonal
    # block Frobenius sum. No D x D iotas / masks inside VMEM.
    gram = jnp.sum(partial_gram, axis=0)                  # A^T A          (D, D)
    mu = jnp.sum(partial_sum, axis=0) / jnp.float32(n)    # column means   (1, D)
    g = gram - jnp.float32(n) * (mu.T @ mu)               # centered Gram G = B^T B
    total = jnp.sum(g * g)
    diag = jnp.float32(0.0)
    for grp in range(N_GROUPS):
        blk = g[grp * embedding_size:(grp + 1) * embedding_size,
                grp * embedding_size:(grp + 1) * embedding_size]
        diag = diag + jnp.sum(blk * blk)
    loss = 0.5 * (total - diag) / jnp.float32((n - 1) * (n - 1))
    return loss.reshape(1)


def hsic_weight_ref(final_readout, weight, embedding_size):
    """Pure-JAX mirror of the PyTorch forward (for verification)."""
    n = final_readout.shape[0]
    sw = weight * weight
    R = jnp.eye(n, dtype=jnp.float32) - jnp.ones((n, n), jnp.float32) / n
    W1 = sw @ sw.T
    loss = jnp.zeros((1,), jnp.float32)
    for i in range(N_GROUPS - 1):
        for j in range(i + 1, N_GROUPS):
            f1 = final_readout[:, i * embedding_size:(i + 1) * embedding_size]
            f2 = final_readout[:, j * embedding_size:(j + 1) * embedding_size]
            K1 = W1 * (f1 @ f1.T)
            K2 = W1 * (f2 @ f2.T)
            RK1 = R @ K1
            RK2 = R @ K2
            loss = loss + (jnp.trace(RK1 @ RK2) / ((n - 1) * (n - 1))).reshape(1)
    return loss


if __name__ == "__main__":
    embedding_size = 16   # per-group embedding width -> D = 160
    key = jax.random.PRNGKey(0)
    k1, k2, k3 = jax.random.split(key, 3)

    # Case 1: single-tile path, weight = ones (matches nn.Parameter init).
    n1 = 64
    fr1 = jax.random.normal(k1, (n1, N_GROUPS * embedding_size), jnp.float32)
    w1 = jnp.ones((n1, 1), jnp.float32)
    out1 = jax.block_until_ready(hsic_weight_forward(fr1, w1, embedding_size))
    ref1 = hsic_weight_ref(fr1, w1, embedding_size)
    assert out1.shape == (1,)
    assert jnp.allclose(out1, ref1, rtol=2e-3, atol=1e-2), (out1, ref1)

    # Case 2: ragged multi-tile + 2-way parallel split (n=80, row_tile=32:
    # 3 real tiles, one fully-masked phantom tile, in-kernel edge masking).
    n2 = 80
    fr2 = jax.random.normal(k2, (n2, N_GROUPS * embedding_size), jnp.float32)
    w2 = 1.0 + 0.1 * jax.random.normal(k3, (n2, 1), jnp.float32)
    out2 = jax.block_until_ready(
        hsic_weight_forward(fr2, w2, embedding_size, row_tile=32))
    ref2 = hsic_weight_ref(fr2, w2, embedding_size)
    assert jnp.allclose(out2, ref2, rtol=2e-3, atol=1e-2), (out2, ref2)

    # Case 3: native-bf16 streamed features (no wrapper upcast); compute stays f32.
    fr3 = fr2.astype(jnp.bfloat16)
    out3 = jax.block_until_ready(hsic_weight_forward(fr3, w2, embedding_size))
    ref3 = hsic_weight_ref(fr3.astype(jnp.float32), w2, embedding_size)
    assert jnp.allclose(out3, ref3, rtol=2e-3, atol=1e-2), (out3, ref3)

    print("KERNEL_OK")
</pallas_src>

<mosaic_0001>
module attributes {stable_mosaic.version = 11 : i64} {
  func.func @hsic_partial_kernel(%arg0: i32, %arg1: i32, %arg2: memref<64x160xf32, #tpu.memory_space<vmem>>, %arg3: memref<64x1xf32, #tpu.memory_space<vmem>>, %arg4: memref<1x160x160xf32, #tpu.memory_space<vmem>>, %arg5: memref<1x1x160xf32, #tpu.memory_space<vmem>>) attributes {dimension_semantics = [#tpu.dimension_semantics<parallel>, #tpu.dimension_semantics<arbitrary>], iteration_bounds = array<i64: 1, 1>, scalar_prefetch = 0 : i64, scratch_operands = 0 : i64, tpu.core_type = #tpu.core_type<tc>, window_params = [{transform_indices = @transform_0, window_bounds = array<i64: 64, 160>}, {transform_indices = @transform_1, window_bounds = array<i64: 64, 1>}, {transform_indices = @transform_2, window_bounds = array<i64: 1, 160, 160>}, {transform_indices = @transform_3, window_bounds = array<i64: 1, 1, 160>}]} {
    %c0_i32 = arith.constant 0 : i32
    %0 = arith.cmpi eq, %arg1, %c0_i32 : i32
    %1 = arith.extui %0 : i1 to i32
    %c0_i32_0 = arith.constant 0 : i32
    %2 = arith.cmpi ne, %1, %c0_i32_0 : i32
    scf.if %2 {
      %cst_17 = arith.constant 0.000000e+00 : f32
      %23 = vector.broadcast %cst_17 : f32 to vector<160x160xf32>
      %c0_18 = arith.constant 0 : index
      %c0_19 = arith.constant 0 : index
      %c0_20 = arith.constant 0 : index
      %24 = vector.load %arg4[%c0_18, %c0_19, %c0_20] : memref<1x160x160xf32, #tpu.memory_space<vmem>>, vector<1x160x160xf32>
      %25 = vector.shape_cast %24 : vector<1x160x160xf32> to vector<160x160xf32>
      %26 = vector.shape_cast %23 : vector<160x160xf32> to vector<1x160x160xf32>
      tpu.vector_store %arg4[%c0_18, %c0_19, %c0_20], %26 {strides = array<i32>} : memref<1x160x160xf32, #tpu.memory_space<vmem>>, vector<1x160x160xf32>,
      %cst_21 = arith.constant 0.000000e+00 : f32
      %27 = vector.broadcast %cst_21 : f32 to vector<1x160xf32>
      %c0_22 = arith.constant 0 : index
      %c0_23 = arith.constant 0 : index
      %c0_24 = arith.constant 0 : index
      %28 = vector.load %arg5[%c0_22, %c0_23, %c0_24] : memref<1x1x160xf32, #tpu.memory_space<vmem>>, vector<1x1x160xf32>
      %29 = vector.shape_cast %28 : vector<1x1x160xf32> to vector<1x160xf32>
      %30 = vector.shape_cast %27 : vector<1x160xf32> to vector<1x1x160xf32>
      tpu.vector_store %arg5[%c0_22, %c0_23, %c0_24], %30 {strides = array<i32>} : memref<1x1x160xf32, #tpu.memory_space<vmem>>, vector<1x1x160xf32>,
    } else {
    }
    %c0 = arith.constant 0 : index
    %c0_1 = arith.constant 0 : index
    %3 = vector.load %arg3[%c0, %c0_1] : memref<64x1xf32, #tpu.memory_space<vmem>>, vector<64x1xf32>
    %c0_2 = arith.constant 0 : index
    %c0_3 = arith.constant 0 : index
    %4 = vector.load %arg2[%c0_2, %c0_3] : memref<64x160xf32, #tpu.memory_space<vmem>>, vector<64x160xf32>
    %5 = arith.mulf %3, %3 : vector<64x1xf32>
    %6 = vector.broadcast %5 : vector<64x1xf32> to vector<64x160xf32>
    %7 = arith.mulf %4, %6 : vector<64x160xf32>
    %c0_4 = arith.constant 0 : index
    %c0_5 = arith.constant 0 : index
    %c0_6 = arith.constant 0 : index
    %8 = vector.load %arg4[%c0_4, %c0_5, %c0_6] : memref<1x160x160xf32, #tpu.memory_space<vmem>>, vector<1x160x160xf32>
    %9 = vector.shape_cast %8 : vector<1x160x160xf32> to vector<160x160xf32>
    %cst = arith.constant dense<0.000000e+00> : vector<160x160xf32>
    %10 = tpu.matmul %7, %7, %cst {dimension_numbers = #tpu.dot_dimension_numbers<[0], [0], [1], [1], [0, 1, 1, 1], [], []>, precision = #tpu.contract_precision<fp32>} : vector<64x160xf32>, vector<64x160xf32>, vector<160x160xf32> -> vector<160x160xf32>
    %11 = arith.addf %9, %10 : vector<160x160xf32>
    %c0_7 = arith.constant 0 : index
    %c0_8 = arith.constant 0 : index
    %c0_9 = arith.constant 0 : index
    %12 = vector.load %arg4[%c0_7, %c0_8, %c0_9] : memref<1x160x160xf32, #tpu.memory_space<vmem>>, vector<1x160x160xf32>
    %13 = vector.shape_cast %12 : vector<1x160x160xf32> to vector<160x160xf32>
    %14 = vector.shape_cast %11 : vector<160x160xf32> to vector<1x160x160xf32>
    tpu.vector_store %arg4[%c0_7, %c0_8, %c0_9], %14 {strides = array<i32>} : memref<1x160x160xf32, #tpu.memory_space<vmem>>, vector<1x160x160xf32>,
    %c0_10 = arith.constant 0 : index
    %c0_11 = arith.constant 0 : index
    %c0_12 = arith.constant 0 : index
    %15 = vector.load %arg5[%c0_10, %c0_11, %c0_12] : memref<1x1x160xf32, #tpu.memory_space<vmem>>, vector<1x1x160xf32>
    %16 = vector.shape_cast %15 : vector<1x1x160xf32> to vector<1x160xf32>
    %cst_13 = arith.constant dense<0.000000e+00> : vector<160xf32>
    %17 = vector.multi_reduction <add>, %7, %cst_13 [0] : vector<64x160xf32> to vector<160xf32>
    %18 = vector.shape_cast %17 : vector<160xf32> to vector<1x160xf32>
    %19 = arith.addf %16, %18 : vector<1x160xf32>
    %c0_14 = arith.constant 0 : index
    %c0_15 = arith.constant 0 : index
    %c0_16 = arith.constant 0 : index
    %20 = vector.load %arg5[%c0_14, %c0_15, %c0_16] : memref<1x1x160xf32, #tpu.memory_space<vmem>>, vector<1x1x160xf32>
    %21 = vector.shape_cast %20 : vector<1x1x160xf32> to vector<1x160xf32>
    %22 = vector.shape_cast %19 : vector<1x160xf32> to vector<1x1x160xf32>
    tpu.vector_store %arg5[%c0_14, %c0_15, %c0_16], %22 {strides = array<i32>} : memref<1x1x160xf32, #tpu.memory_space<vmem>>, vector<1x1x160xf32>,
    return
  }
  func.func @transform_0(%arg0: i32, %arg1: i32) -> (i32, i32) {
    %c1_i32 = arith.constant 1 : i32
    %0 = arith.muli %arg0, %c1_i32 : i32
    %1 = arith.addi %0, %arg1 : i32
    %c0_i32 = arith.constant 0 : i32
    %2 = arith.minsi %1, %c0_i32 : i32
    %c0_i32_0 = arith.constant 0 : i32
    %c0_i32_1 = arith.constant 0 : i32
    return %2, %c0_i32_0 : i32, i32
  }
  func.func @transform_1(%arg0: i32, %arg1: i32) -> (i32, i32) {
    %c1_i32 = arith.constant 1 : i32
    %0 = arith.muli %arg0, %c1_i32 : i32
    %1 = arith.addi %0, %arg1 : i32
    %c0_i32 = arith.constant 0 : i32
    %2 = arith.minsi %1, %c0_i32 : i32
    %c0_i32_0 = arith.constant 0 : i32
    %c0_i32_1 = arith.constant 0 : i32
    return %2, %c0_i32_0 : i32, i32
  }
  func.func @transform_2(%arg0: i32, %arg1: i32) -> (i32, i32, i32) {
    %c0_i32 = arith.constant 0 : i32
    %c0_i32_0 = arith.constant 0 : i32
    %c0_i32_1 = arith.constant 0 : i32
    return %arg0, %c0_i32, %c0_i32_0 : i32, i32, i32
  }
  func.func @transform_3(%arg0: i32, %arg1: i32) -> (i32, i32, i32) {
    %c0_i32 = arith.constant 0 : i32
    %c0_i32_0 = arith.constant 0 : i32
    %c0_i32_1 = arith.constant 0 : i32
    return %arg0, %c0_i32, %c0_i32_0 : i32, i32, i32
  }
}

</mosaic_0001>

<bundles_post_ra>
// kernel: tpu_custom_call.1
= control target key start
LH: loop header
LB: loop body
LE: loop exit
PB: predicated region body
PF: predicated region fallthrough
CT: control target
= control target key end

     0   :  { %9 = vsyncpa [#allocation3], 0  ;;  %s3390_s0 = inlined_call_operand.hbm [shape: f32[64,160], index: 0, kind: input, shape index: {}]   ;;  %s3391_s1 = inlined_call_operand.vmem [shape: f32[64,1], index: 1, kind: input, shape index: {}]   ;;  %s3392_s2 = inlined_call_operand.hbm [shape: f32[1,160,160], index: 2, kind: output, shape index: {0}]   ;;  %s3393_s3 = inlined_call_operand.hbm [shape: f32[1,1,160], index: 3, kind: output, shape index: {1}]  }
   0x1   :  { %10 = vsyncpa [#allocation4], 0 }
   0x2   :  { %11 = vsyncpa [#allocation7], 0  ;;  %s23_s14 = sshll.u32 %s3390_s0, 4  ;;  %s2288_s15 = smov [#allocation2]   ;;  %s24_s14 = int_to_ptr.hbm [resolvable:$true] %s23_s14 }
   0x3   :  { %s25_s16 = sshll.u32 %s2288_s15, 4  ;;  %s2289_s17 = smov 256   ;;  %s26_s16 = int_to_ptr.vmem [resolvable:$true] %s25_s16 }
   0x4   :  { %s2290_s18 = smov 16  }
   0x5   :  { %31 = dma.hbm_to_vmem [thread:$0]  %s24_s14, 2048, %s26_s16, [#allocation3], %s2289_s17, %s2289_s17, %s2290_s18  }
   0x6   :  { %2282 = dma.done.wait [#allocation3], 2048  }
   0x7   :  { %2283 = vsyncadd [#allocation3], 4294965248  ;;  %v2291_v0 = vmov 0   ;;  %v126_v1 = vld [vmem:[%s3391_s1 + $0x10] sm:$0xff]  ;;  %v124_v2 = vld [vmem:[%s3391_s1] sm:$0xff]  ;;  %vm79_vm0 = vcmask 261120  }
   0x8   :  { %2208 = vset.pattern.permute.xlu1 %v2291_v0  ;;  %2207 = vset.pattern.permute.xlu0 %v2291_v0  ;;  %v150_v3 = vmul.f32 %v126_v1, %v126_v1  ;;  %v148_v4 = vmul.f32 %v124_v2, %v124_v2  ;;  %v128_v5 = vld [vmem:[%s3391_s1 + $0x20] sm:$0xff]  ;;  %v127_v7 = vld [vmem:[%s3391_s1 + $0x18] sm:$0xff]  ;;  %v125_v8 = vld [vmem:[%s3391_s1 + $0x8] sm:$0xff]  ;;  %vm2148_vm2 = vcmask 1040384   ;;  %vm316_vm3 = vcmask 523264   ;;  %s2177_s10 = sshll.u32 %s3393_s3, 4  ;;  %s2178_s10 = int_to_ptr.hbm [resolvable:$true] %s2177_s10 }
   0x9   :  { %2209 = vset.pattern.permute.xlu2 %v2291_v0  ;;  %v152_v6 = vmul.f32 %v128_v5, %v128_v5  ;;  %v129_v9 = vld [vmem:[%s3391_s1 + $0x28] sm:$0xff]  ;;  %v151_v10 = vmul.f32 %v127_v7, %v127_v7  ;;  %v149_v11 = vmul.f32 %v125_v8, %v125_v8  ;;  %v131_v13 = vld [vmem:[%s3391_s1 + $0x38] sm:$0xff]  ;;  %v130_v14 = vld [vmem:[%s3391_s1 + $0x30] sm:$0xff]  ;;  %s2293_s1 = smov [#allocation6]   ;;  %s2294_s3 = smov [#allocation5]  }
   0xa   :  { %168 = vperm.xlu1 %2208, %v150_v3   ;;  %158 = vperm.xlu0 %2207, %v148_v4   ;;  %v153_v12 = vmul.f32 %v129_v9, %v129_v9  ;;  %v155_v15 = vmul.f32 %v131_v13, %v131_v13  ;;  %v154_v16 = vmul.f32 %v130_v14, %v130_v14  ;;  %v132_v18 = vld [vmem:[#allocation2] sm:$0xff]  ;;  %v133_v19 = vld [vmem:[#allocation2 + $0x8] sm:$0xff]  ;;  %v134_v26 = vld [vmem:[#allocation2 + $0x10] sm:$0xff]  ;;  %s2175_s7 = sshll.u32 %s2293_s1, 4  ;;  %s2161_s11 = sshll.u32 %s2294_s3, 4  ;;  %s2176_s7 = int_to_ptr.vmem [resolvable:$true] %s2175_s7  ;;  %s2162_s11 = int_to_ptr.vmem [resolvable:$true] %s2161_s11 }
   0xb   :  { %178 = vperm.xlu2 %2209, %v152_v6   ;;  %v136_v24 = vld [vmem:[#allocation2 + $0x20] sm:$0xff]  ;;  %v137_v25 = vld [vmem:[#allocation2 + $0x28] sm:$0xff]  ;;  %v135_v27 = vld [vmem:[#allocation2 + $0x18] sm:$0xff]  ;;  %s2163_s14 = sshll.u32 %s3392_s2, 4  ;;  %s2164_s14 = int_to_ptr.hbm [resolvable:$true] %s2163_s14 }
   0xc   :  { %v142_v28 = vld [vmem:[#allocation2 + $0x50] sm:$0xff]  ;;  %v139_v30 = vld [vmem:[#allocation2 + $0x38] sm:$0xff]  ;;  %v141_v36 = vld [vmem:[#allocation2 + $0x48] sm:$0xff] }
   0xd   :  { %v138_v32 = vld [vmem:[#allocation2 + $0x30] sm:$0xff]  ;;  %v140_v40 = vld [vmem:[#allocation2 + $0x40] sm:$0xff]  ;;  %v143_v44 = vld [vmem:[#allocation2 + $0x58] sm:$0xff] }
   0xe   :  { %v146_v55 = vld [vmem:[#allocation2 + $0x70] sm:$0xff]  ;;  %v147_v56 = vld [vmem:[#allocation2 + $0x78] sm:$0xff]  ;;  %v144_v59 = vld [vmem:[#allocation2 + $0x60] sm:$0xff] }
   0xf   :  { %v145_v60 = vld [vmem:[#allocation2 + $0x68] sm:$0xff] }
  0x12   :  { %173 = vperm.xlu1 %2208, %v151_v10   ;;  %163 = vperm.xlu0 %2207, %v149_v11  }
  0x13   :  { %183 = vperm.xlu2 %2209, %v153_v12  }
  0x1a   :  { %193 = vperm.xlu1 %2208, %v155_v15   ;;  %188 = vperm.xlu0 %2207, %v154_v16  }
  0x65   :  { %v179_v17 = vpop.permute.xlu2 %178 }
  0x66   :  { %v2376_v48 = vmul.f32 %v179_v17, %v141_v36  ;;  %v2380_v50 = vmul.f32 %v179_v17, %v140_v40 }
  0x68   :  { %v2131_v62 = vsel %vm79_vm0, %v2376_v48, 0.0  ;;  %v2395_v1 = vand.u32 4294901760, %v2380_v50 }
  0x6a   :  { %v2426_v17 = vsub.f32 %v2380_v50, %v2395_v1 }
  0x6c   :  { %v590_v36 = vand.u32 4294901760, %v2426_v17 }
  0x6d   :  { %v184_v29 = vpop.permute.xlu2 %183 }
  0x6e   :  { %v2359_v39 = vmul.f32 %v184_v29, %v142_v28  ;;  %v2385_v54 = vmul.f32 %v184_v29, %v143_v44 }
  0x70   :  { %v2370_v45 = vand.u32 4294901760, %v2359_v39  ;;  %v2133_v6 = vsel %vm79_vm0, %v2385_v54, 0.0  ;;  %v2419_v14 = vand.u32 4294901760, %v2385_v54 }
  0x72   :  { %v2390_v61 = vsub.f32 %v2359_v39, %v2370_v45 }
  0x74   :  { %v584_v10 = vand.u32 4294901760, %v2390_v61 }
  0x7c   :  { %v169_v20 = vpop.permute.xlu1 %168  ;;  %v159_v21 = vpop.permute.xlu0 %158 }
  0x7d   :  { %v2345_v22 = vmul.f32 %v159_v21, %v132_v18  ;;  %v2347_v23 = vmul.f32 %v159_v21, %v133_v19  ;;  %v2351_v31 = vmul.f32 %v169_v20, %v137_v25  ;;  %v2353_v35 = vmul.f32 %v169_v20, %v136_v24 }
  0x7f   :  { %284 = vxpose.xlu0.b32.start [1/8] (short) (narrow) %v2347_v23, 32  ;;  %252 = vxpose.xlu2.b32.start [1/8] (short) %v2345_v22, 128  ;;  %v2127_v46 = vsel %vm79_vm0, %v2351_v31, 0.0  ;;  %v2124_v47 = vsel %vm79_vm0, %v2347_v23, 0.0 }
  0x84   :  { %v174_v33 = vpop.permute.xlu1 %173  ;;  %v164_v34 = vpop.permute.xlu0 %163 }
  0x85   :  { %v2355_v37 = vmul.f32 %v164_v34, %v134_v26  ;;  %v2357_v38 = vmul.f32 %v164_v34, %v135_v27  ;;  %v2361_v41 = vmul.f32 %v174_v33, %v139_v30  ;;  %v2363_v42 = vmul.f32 %v174_v33, %v138_v32 }
  0x86   :  { %v2446_v26 = vand.u32 4294901760, %v2353_v35  ;;  %v2451_v27 = vsub.f32 %v2390_v61, %v584_v10  ;;  %v2462_v33 = vand.u32 4294901760, %v2376_v48 }
  0x87   :  { %v2111_v43 = vadd.f32 %v2355_v37, %v2345_v22  ;;  %285 = vxpose.xlu0.b32.cont [2/8] (short) (narrow) %v2357_v38, 32  ;;  %253 = vxpose.xlu2.b32.cont [2/8] (short) %v2355_v37, 128  ;;  %v2125_v49 = vsel %vm79_vm0, %v2357_v38, 0.0  ;;  %v2129_v53 = vsel %vm79_vm0, %v2361_v41, 0.0  ;;  %v2441_v21 = vand.u32 4294901760, %v2363_v42 }
  0x88   :  { %v2126_v52 = vadd.f32 %v2125_v49, %v2124_v47  ;;  %v2483_v47 = vand.u32 4294901760, %v2355_v37 }
  0x89   :  { %v2112_v51 = vadd.f32 %v2111_v43, %v2353_v35 }
  0x8a   :  { %v2128_v57 = vadd.f32 %v2127_v46, %v2126_v52  ;;  %v2480_v46 = vsub.f32 %v2363_v42, %v2441_v21  ;;  %v2490_v52 = vsub.f32 %v2353_v35, %v2446_v26 }
  0x8b   :  { %v2113_v58 = vadd.f32 %v2112_v51, %v2363_v42  ;;  %v586_v51 = vand.u32 4294901760, %v2451_v27 }
  0x8c   :  { %v194_v63 = vpop.permute.xlu1 %193  ;;  %v189_v0 = vpop.permute.xlu0 %188  ;;  %v2130_v3 = vadd.f32 %v2129_v53, %v2128_v57  ;;  %v2494_v53 = vsub.f32 %v2385_v54, %v2419_v14 }
  0x8d   :  { %v2114_v2 = vadd.f32 %v2113_v58, %v2380_v50  ;;  %v2398_v4 = vmul.f32 %v194_v63, %v146_v55  ;;  %v2400_v5 = vmul.f32 %v194_v63, %v147_v56  ;;  %v2404_v7 = vmul.f32 %v189_v0, %v144_v59 }
  0x8e   :  { %v2406_v8 = vmul.f32 %v189_v0, %v145_v60  ;;  %v2132_v9 = vadd.f32 %v2131_v62, %v2130_v3  ;;  %v591_v58 = vsub.f32 %v2426_v17, %v590_v36  ;;  %v2514_v59 = vsub.f32 %v2376_v48, %v2462_v33 }
  0x8f   :  { %286 = vxpose.xlu0.b32.cont [3/8] (short) (narrow) %v2351_v31, 32  ;;  %254 = vxpose.xlu2.b32.cont [3/8] (short) %v2353_v35, 128  ;;  %v2115_v11 = vadd.f32 %v2114_v2, %v2359_v39  ;;  %v2413_v12 = vand.u32 4294901760, %v2398_v4  ;;  %v2416_v13 = vand.u32 4294901760, %v2404_v7  ;;  %v2422_v16 = vand.u32 4294901760, %v2400_v5 }
  0x90   :  { %v2134_v15 = vadd.f32 %v2133_v6, %v2132_v9  ;;  %v2135_v18 = vsel %vm79_vm0, %v2406_v8, 0.0  ;;  %v2137_v24 = vsel %vm79_vm0, %v2400_v5, 0.0  ;;  %v2454_v28 = vand.u32 4294901760, %v2406_v8 }
  0x91   :  { %386 = vmatpush.msra.mxu0 %v2413_v12  ;;  %841 = vmatpush.msra.mxu3 %v2413_v12  ;;  %v2434_v19 = vsub.f32 %v2398_v4, %v2413_v12  ;;  %v2438_v20 = vsub.f32 %v2404_v7, %v2416_v13  ;;  %v2116_v29 = vadd.f32 %v2115_v11, %v2404_v7  ;;  %v2506_v35 = vand.u32 4294901760, %v2345_v22 }
  0x92   :  { %v2136_v25 = vadd.f32 %v2135_v18, %v2134_v15  ;;  %v2468_v40 = vsub.f32 %v2400_v5, %v2422_v16  ;;  %v2501_v57 = vsub.f32 %v2406_v8, %v2454_v28  ;;  %v2292_v60 = vmov 0.0  }
  0x93   :  { %388 = vmatpush.msra.mxu0 %v2416_v13  ;;  %709 = vmatpush.msra.mxu2 %v2434_v19  ;;  %v572_v30 = vand.u32 4294901760, %v2434_v19  ;;  %v578_v32 = vand.u32 4294901760, %v2438_v20  ;;  %v2117_v55 = vadd.f32 %v2116_v29, %v2398_v4  ;;  %80 = vst.msk [vmem:[#allocation5 + $0x8] sm:$0xff] %vm79_vm0, %v2292_v60  ;;  %v2521_v0 = vsub.f32 %v2355_v37, %v2483_v47 }
  0x94   :  { %v2138_v34 = vadd.f32 %v2137_v24, %v2136_v25  ;;  %843 = vmatpush.msra.mxu3 %v2416_v13  ;;  %v596_v2 = vand.u32 4294901760, %v2480_v46  ;;  %82 = vst.msk [vmem:[#allocation5 + $0x18] sm:$0xff] %vm79_vm0, %v2292_v60  ;;  %v2527_v3 = vand.u32 4294901760, %v2361_v41  ;;  %v3395_v6 = vand.u32 4294901760, %v2494_v53 }
  0x95   :  { %390 = vmatpush.msra.mxu0 %v2370_v45  ;;  %712 = vmatpush.msra.mxu2 %v2438_v20  ;;  %v573_v43 = vsub.f32 %v2434_v19, %v572_v30  ;;  %v579_v44 = vsub.f32 %v2438_v20, %v578_v32  ;;  %84 = vst.msk [vmem:[#allocation5 + $0x28] sm:$0xff] %vm79_vm0, %v2292_v60  ;;  %v2535_v37 = vand.u32 4294901760, %v2351_v31  ;;  %v2118_v9 = vrot.slane %v2117_v55, 4 }
  0x96   :  { %v2139_v49 = vrot.slane %v2138_v34, 4  ;;  %845 = vmatpush.msra.mxu3 %v2370_v45  ;;  %v1404_v11 = vand.u32 4294901760, %v2501_v57  ;;  %v602_v15 = vand.u32 4294901760, %v2490_v52  ;;  %86 = vst.msk [vmem:[#allocation5 + $0x38] sm:$0xff] %vm79_vm0, %v2292_v60  ;;  %v592_v18 = vand.u32 4294901760, %v591_v58 }
  0x97   :  { %287 = vxpose.xlu0.b32.cont [4/8] (short) (narrow) %v2361_v41, 32  ;;  %255 = vxpose.xlu2.b32.cont [4/8] (short) %v2363_v42, 128  ;;  %v574_v56 = vand.u32 4294901760, %v573_v43  ;;  %v1398_v42 = vand.u32 4294901760, %v2468_v40  ;;  %v580_v63 = vand.u32 4294901760, %v579_v44  ;;  %v2549_v25 = vsub.f32 %v2345_v22, %v2506_v35  ;;  %88 = vst.msk [vmem:[#allocation5 + $0x48] sm:$0xff] %vm79_vm0, %v2292_v60 }
  0x98   :  { %392 = vmatpush.msra.mxu0 %v2395_v1  ;;  %715 = vmatpush.msra.mxu2 %v2390_v61  ;;  %v2140_v62 = vadd.f32 %v2139_v49, %v2138_v34  ;;  %v3394_v27 = vand.u32 4294901760, %v2514_v59  ;;  %v597_v34 = vsub.f32 %v2480_v46, %v596_v2  ;;  %v608_v43 = vand.u32 4294901760, %v2521_v0  ;;  %90 = vst.msk [vmem:[#allocation5 + $0x58] sm:$0xff] %vm79_vm0, %v2292_v60 }
  0x99   :  { %847 = vmatpush.msra.mxu3 %v2395_v1  ;;  %575 = vmatpush.msra.mxu1 %v574_v56  ;;  %v1399_v24 = vsub.f32 %v2468_v40, %v1398_v42  ;;  %v2562_v22 = vand.u32 4294901760, %v2347_v23  ;;  %v2565_v44 = vand.u32 4294901760, %v2357_v38  ;;  %v1411_v49 = vsub.f32 %v2494_v53, %v3395_v6  ;;  %92 = vst.msk [vmem:[#allocation5 + $0x68] sm:$0xff] %vm79_vm0, %v2292_v60 }
  0x9a   :  { %394 = vmatpush.msra.mxu0 %v2441_v21  ;;  %718 = vmatpush.msra.mxu2 %v2426_v17  ;;  %v2141_v29 = vrot.slane %v2140_v62, 2  ;;  %v2119_v56 = vadd.f32 %v2118_v9, %v2117_v55  ;;  %v1405_v58 = vsub.f32 %v2501_v57, %v1404_v11  ;;  %94 = vst.msk [vmem:[#allocation5 + $0x78] sm:$0xff] %vm79_vm0, %v2292_v60 }
  0x9b   :  { %849 = vmatpush.msra.mxu3 %v2441_v21  ;;  %581 = vmatpush.msra.mxu1 %v580_v63  ;;  %v603_v63 = vsub.f32 %v2490_v52, %v602_v15  ;;  %v2595_v55 = vsub.f32 %v2351_v31, %v2535_v37  ;;  %96 = vst.msk [vmem:[#allocation5 + $0x88] sm:$0xff] %vm79_vm0, %v2292_v60  ;;  %v1412_v6 = vand.u32 4294901760, %v1411_v49 }
  0x9c   :  { %396 = vmatpush.msra.mxu0 %v2446_v26  ;;  %721 = vmatpush.msra.mxu2 %v2480_v46  ;;  %v2142_v9 = vadd.f32 %v2141_v29, %v2140_v62  ;;  %98 = vst.msk [vmem:[#allocation5 + $0x98] sm:$0xff] %vm79_vm0, %v2292_v60  ;;  %v2611_v62 = vsub.f32 %v2357_v38, %v2565_v44  ;;  %v2120_v29 = vrot.slane %v2119_v56, 2 }
  0x9d   :  { %851 = vmatpush.msra.mxu3 %v2446_v26  ;;  %587 = vmatpush.msra.mxu1 %v586_v51  ;;  %v2574_v51 = vsub.f32 %v2361_v41, %v2527_v3  ;;  %v1400_v41 = vand.u32 4294901760, %v1399_v24  ;;  %v609_v24 = vsub.f32 %v2521_v0, %v608_v43  ;;  %100 = vst.msk [vmem:[#allocation5 + $0xa8] sm:$0xff] %vm79_vm0, %v2292_v60  ;;  %v1428_v19 = vand.u32 4294901760, %v2595_v55 }
  0x9e   :  { %398 = vmatpush.msra.mxu0 %v2483_v47  ;;  %724 = vmatpush.msra.mxu2 %v2490_v52  ;;  %102 = vst.msk [vmem:[#allocation5 + $0xb8] sm:$0xff] %vm79_vm0, %v2292_v60 }
  0x9f   :  { %853 = vmatpush.msra.mxu3 %v2483_v47  ;;  %288 = vxpose.xlu0.b32.cont [5/8] (short) (narrow) %v2376_v48, 32  ;;  %v1417_v48 = vsub.f32 %v2514_v59, %v3394_v27  ;;  %v1422_v31 = vand.u32 4294901760, %v2574_v51  ;;  %v604_v27 = vand.u32 4294901760, %v603_v63  ;;  %104 = vst.msk [vmem:[#allocation5 + $0xc8] sm:$0xff] %vm79_vm0, %v2292_v60  ;;  %v610_v49 = vand.u32 4294901760, %v609_v24 }
  0xa0   :  { %256 = vxpose.xlu2.b32.cont [5/8] (short) %v2380_v50, 128  ;;  %400 = vmatpush.msra.mxu0 %v2506_v35  ;;  %v614_v50 = vand.u32 4294901760, %v2549_v25  ;;  %106 = vst.msk [vmem:[#allocation5 + $0xd8] sm:$0xff] %vm79_vm0, %v2292_v60  ;;  %v1434_v63 = vand.u32 4294901760, %v2611_v62 }
  0xa1   :  { %593 = vmatpush.msra.mxu1 %v592_v18  ;;  %727 = vmatpush.msra.mxu2 %v2521_v0  ;;  %v598_v18 = vand.u32 4294901760, %v597_v34  ;;  %v1406_v34 = vand.u32 4294901760, %v1405_v58  ;;  %v1418_v20 = vand.u32 4294901760, %v1417_v48  ;;  %v2143_v58 = vrot.slane %v2142_v9, 1  ;;  %108 = vst.msk [vmem:[#allocation5 + $0xe8] sm:$0xff] %vm79_vm0, %v2292_v60 }
  0xa2   :  { %855 = vmatpush.msra.mxu3 %v2506_v35  ;;  %988 = vmatpush.msrb.mxu0 %v572_v30  ;;  %v615_v38 = vsub.f32 %v2549_v25, %v614_v50  ;;  %v2627_v30 = vsub.f32 %v2347_v23, %v2562_v22  ;;  %v1423_v23 = vsub.f32 %v2574_v51, %v1422_v31 }
  0xa3   :  { %599 = vmatpush.msra.mxu1 %v598_v18  ;;  %730 = vmatpush.msra.mxu2 %v2549_v25  ;;  %110 = vst.msk [vmem:[#allocation5 + $0xf8] sm:$0xff] %vm79_vm0, %v2292_v60 }
  0xa4   :  { %1401 = vmatpush.msrb.mxu3 %v1400_v41  ;;  %992 = vmatpush.msrb.mxu0 %v578_v32  ;;  %v119_v32 = vlaneseq  ;;  %v616_v61 = vand.u32 4294901760, %v615_v38  ;;  %v1440_v41 = vand.u32 4294901760, %v2627_v30  ;;  %112 = vst.msk [vmem:[#allocation5 + $0x108] sm:$0xff] %vm79_vm0, %v2292_v60 }
  0xa5   :  { %1212 = vmatpush.msrb.mxu2 %v2422_v16  ;;  %605 = vmatpush.msra.mxu1 %v604_v27  ;;  %v2121_v27 = vadd.f32 %v2120_v29, %v2119_v56  ;;  %114 = vst.msk [vmem:[#allocation5 + $0x118] sm:$0xff] %vm79_vm0, %v2292_v60  ;;  %v1435_v56 = vsub.f32 %v2611_v62, %v1434_v63 }
  0xa6   :  { %1407 = vmatpush.msrb.mxu3 %v1406_v34  ;;  %996 = vmatpush.msrb.mxu0 %v584_v10  ;;  %v1429_v10 = vsub.f32 %v2595_v55, %v1428_v19  ;;  %vm2656_vm1 = vcmp.lt.s32.totalorder %v119_v32, 160  ;;  %116 = vst.msk [vmem:[#allocation5 + $0x128] sm:$0xff] %vm79_vm0, %v2292_v60  ;;  %v1441_v48 = vsub.f32 %v2627_v30, %v1440_v41 }
  0xa7   :  { %1214 = vmatpush.msrb.mxu2 %v2454_v28  ;;  %611 = vmatpush.msra.mxu1 %v610_v49  ;;  %118 = vst.msk [vmem:[#allocation5 + $0x138] sm:$0xff] %vm79_vm0, %v2292_v60  ;;  %v1436_v46 = vand.u32 4294901760, %v1435_v56 }
  0xa8   :  { %1413 = vmatpush.msrb.mxu3 %v1412_v6  ;;  %1000 = vmatpush.msrb.mxu0 %v590_v36  ;;  %v2144_v36 = vadd.f32 %v2143_v58, %v2142_v9  ;;  %v1424_v6 = vand.u32 4294901760, %v1423_v23  ;;  %123 = vst.msk [vmem:[#allocation6] sm:$0x3] %vm2656_vm1, %v2292_v60  ;;  %v1442_v60 = vand.u32 4294901760, %v1441_v48 }
  0xa9   :  { %1216 = vmatpush.msrb.mxu2 %v2419_v14  ;;  %289 = vxpose.xlu0.b32.cont [6/8] (short) (narrow) %v2385_v54, 32  ;;  %v2122_v54 = vrot.slane %v2121_v27, 1 }
  0xaa   :  { %1419 = vmatpush.msrb.mxu3 %v1418_v20  ;;  %257 = vxpose.xlu2.b32.cont [6/8] (short) %v2359_v39, 128  ;;  %v1430_v39 = vand.u32 4294901760, %v1429_v10 }
  0xab   :  { %617 = vmatpush.msra.mxu1 %v616_v61  ;;  %1004 = vmatpush.msrb.mxu0 %v596_v2  ;;  %v2123_v2 = vadd.f32 %v2122_v54, %v2121_v27 }
  0xac   :  { %1218 = vmatpush.msrb.mxu2 %v2462_v33  ;;  %1425 = vmatpush.msrb.mxu3 %v1424_v6 }
  0xad   :  { %1107 = vmatpush.msrb.mxu1 %v2413_v12  ;;  %1008 = vmatpush.msrb.mxu0 %v602_v15  ;;  %v2147_v12 = vrot.slane %v2144_v36, 7 }
  0xae   :  { %1220 = vmatpush.msrb.mxu2 %v2527_v3  ;;  %1431 = vmatpush.msrb.mxu3 %v1430_v39 }
  0xaf   :  { %1109 = vmatpush.msrb.mxu1 %v2416_v13  ;;  %1012 = vmatpush.msrb.mxu0 %v608_v43  ;;  %v2149_v13 = vsel %vm2148_vm2, %v2123_v2, %v2147_v12  ;;  %v2110_v52 = vld [vmem:[#allocation6] sm:$0x3] }
  0xb0   :  { %1222 = vmatpush.msrb.mxu2 %v2535_v37  ;;  %1437 = vmatpush.msrb.mxu3 %v1436_v46 }
  0xb1   :  { %1111 = vmatpush.msrb.mxu1 %v2370_v45  ;;  %1016 = vmatpush.msrb.mxu0 %v614_v50  ;;  %v2151_v45 = vadd.f32 %v2149_v13, %v2110_v52 }
  0xb2   :  { %1224 = vmatpush.msrb.mxu2 %v2565_v44  ;;  %1443 = vmatpush.msrb.mxu3 %v1442_v60 }
  0xb3   :  { %1113 = vmatpush.msrb.mxu1 %v2395_v1  ;;  %290 = vxpose.xlu0.b32.cont [7/8] (short) (narrow) %v2406_v8, 32  ;;  %2156 = vst.msk [vmem:[#allocation6] sm:$0x3] %vm2656_vm1, %v2151_v45 }
  0xb4   :  { %258 = vxpose.xlu2.b32.cont [7/8] (short) %v2404_v7, 128  ;;  %1226 = vmatpush.msrb.mxu2 %v2562_v22  ;;  %2180 = dma.vmem_to_hbm [thread:$0]  %s2176_s7, 32, %s2178_s10, [#allocation7]  }
  0xb5   :  { %1115 = vmatpush.msrb.mxu1 %v2441_v21 }
  0xb7   :  { %1117 = vmatpush.msrb.mxu1 %v2446_v26 }
  0xb9   :  { %1119 = vmatpush.msrb.mxu1 %v2483_v47 }
  0xbb   :  { %1121 = vmatpush.msrb.mxu1 %v2506_v35  ;;  %291 = vxpose.xlu0.b32.end [8/8] (short) (narrow) %v2400_v5, 32 }
  0xbc   :  { %259 = vxpose.xlu2.b32.end [8/8] (short) %v2398_v4, 128 }
 0x11d   :  { %v268_v1 = vpop.trf.xlu2 }
 0x11e   :  { %v318_v7 = vsel %vm316_vm3, %v268_v1, 0 }
 0x11f   :  { %v2702_v8 = vand.u32 4294901760, %v318_v7 }
 0x121   :  { %v2705_v21 = vsub.f32 %v318_v7, %v2702_v8  ;;  %619 = vmatmul.f32.vlgmr.msra.gmra.mxu1 %v2702_v8 }
 0x122   :  { %1667 = vmatpush.msra.mxu1 %v2422_v16 }
 0x123   :  { %733 = vmatmul.f32.vlgmr.msra.gmra.mxu2 %v2705_v21  ;;  %v2711_v26 = vand.u32 4294901760, %v2705_v21 }
 0x124   :  { %1669 = vmatpush.msra.mxu1 %v2454_v28  ;;  %1814 = vmatpush.msra.mxu2 %v1398_v42  ;;  %v3430_v42 = vand.u32 4294901760, %v2494_v53 }
 0x125   :  { %v269_v4 = vpop.trf.xlu2  ;;  %859 = vmatmul.f32.vlgmr.msra.gmra.mxu3 %v2711_v26  ;;  %v404_v5 = vsub.f32 %v2705_v21, %v2711_v26 }
 0x126   :  { %v321_v47 = vsel %vm316_vm3, %v269_v4, 0  ;;  %1671 = vmatpush.msra.mxu1 %v2419_v14  ;;  %1818 = vmatpush.msra.mxu2 %v1404_v11 }
 0x127   :  { %v2723_v35 = vand.u32 4294901760, %v321_v47  ;;  %1933 = vmatpush.msra.mxu3 %v2422_v16  ;;  %v2726_v0 = vand.u32 4294901760, %v404_v5  ;;  %v3431_v16 = vand.u32 4294901760, %v2514_v59 }
 0x128   :  { %1673 = vmatpush.msra.mxu1 %v2462_v33  ;;  %1822 = vmatpush.msra.mxu2 %v3430_v42 }
 0x129   :  { %v2732_v15 = vsub.f32 %v321_v47, %v2723_v35  ;;  %1935 = vmatpush.msra.mxu3 %v2454_v28  ;;  %406 = vmatmul.f32.vlgmr.msra.gmra.mxu0 %v2726_v0 }
 0x12a   :  { %623 = vmatmul.f32.gmra.mxu1 %v2723_v35  ;;  %1535 = vmatpush.msra.mxu0 %v2468_v40 }
 0x12b   :  { %1675 = vmatpush.msra.mxu1 %v2527_v3  ;;  %1826 = vmatpush.msra.mxu2 %v3431_v16  ;;  %v2742_v11 = vand.u32 4294901760, %v2732_v15 }
 0x12c   :  { %1937 = vmatpush.msra.mxu3 %v2419_v14  ;;  %738 = vmatmul.f32.gmra.mxu2 %v2732_v15 }
 0x12d   :  { %1538 = vmatpush.msra.mxu0 %v2501_v57  ;;  %1677 = vmatpush.msra.mxu1 %v2535_v37  ;;  %v270_v28 = vpop.trf.xlu2  ;;  %v412_v40 = vsub.f32 %v2732_v15, %v2742_v11 }
 0x12e   :  { %1830 = vmatpush.msra.mxu2 %v1422_v31  ;;  %1939 = vmatpush.msra.mxu3 %v2462_v33  ;;  %v324_v25 = vsel %vm316_vm3, %v270_v28, 0 }
 0x12f   :  { %v2754_v43 = vand.u32 4294901760, %v324_v25  ;;  %865 = vmatmul.f32.gmra.mxu3 %v2742_v11  ;;  %1541 = vmatpush.msra.mxu0 %v2494_v53  ;;  %v2758_v14 = vand.u32 4294901760, %v412_v40 }
 0x130   :  { %1679 = vmatpush.msra.mxu1 %v2565_v44  ;;  %1834 = vmatpush.msra.mxu2 %v1428_v19 }
 0x131   :  { %v2764_v57 = vsub.f32 %v324_v25, %v2754_v43  ;;  %1941 = vmatpush.msra.mxu3 %v2527_v3  ;;  %1544 = vmatpush.msra.mxu0 %v2514_v59 }
 0x132   :  { %1681 = vmatpush.msra.mxu1 %v2562_v22  ;;  %1838 = vmatpush.msra.mxu2 %v1434_v63 }
 0x133   :  { %1943 = vmatpush.msra.mxu3 %v2535_v37  ;;  %414 = vmatmul.f32.gmra.mxu0 %v2758_v14  ;;  %v2774_v33 = vand.u32 4294901760, %v2764_v57 }
 0x134   :  { %627 = vmatmul.f32.gmra.mxu1 %v2754_v43  ;;  %1547 = vmatpush.msra.mxu0 %v2574_v51 }
 0x135   :  { %1842 = vmatpush.msra.mxu2 %v1440_v41  ;;  %1945 = vmatpush.msra.mxu3 %v2565_v44  ;;  %v271_v53 = vpop.trf.xlu2  ;;  %v420_v59 = vsub.f32 %v2764_v57, %v2774_v33 }
 0x136   :  { %743 = vmatmul.f32.gmra.mxu2 %v2764_v57  ;;  %1550 = vmatpush.msra.mxu0 %v2595_v55  ;;  %v327_v3 = vsel %vm316_vm3, %v271_v53, 0 }
 0x137   :  { %1947 = vmatpush.msra.mxu3 %v2562_v22  ;;  %v2787_v37 = vand.u32 4294901760, %v327_v3  ;;  %v2789_v51 = vand.u32 4294901760, %v420_v59 }
 0x138   :  { %871 = vmatmul.f32.gmra.mxu3 %v2774_v33  ;;  %1553 = vmatpush.msra.mxu0 %v2611_v62 }
 0x139   :  { %v2794_v44 = vsub.f32 %v327_v3, %v2787_v37 }
 0x13a   :  { %1556 = vmatpush.msra.mxu0 %v2627_v30 }
 0x13b   :  { %422 = vmatmul.f32.gmra.mxu0 %v2789_v51  ;;  %v2799_v50 = vand.u32 4294901760, %v2794_v44 }
 0x13c   :  { %631 = vmatmul.f32.gmra.mxu1 %v2787_v37 }
 0x13d   :  { %v272_v22 = vpop.trf.xlu2  ;;  %v428_v55 = vsub.f32 %v2794_v44, %v2799_v50 }
 0x13e   :  { %748 = vmatmul.f32.gmra.mxu2 %v2794_v44  ;;  %v330_v9 = vsel %vm316_vm3, %v272_v22, 0 }
 0x13f   :  { %v2806_v18 = vand.u32 4294901760, %v330_v9  ;;  %v2808_v24 = vand.u32 4294901760, %v428_v55 }
 0x140   :  { %877 = vmatmul.f32.gmra.mxu3 %v2799_v50 }
 0x141   :  { %v2812_v31 = vsub.f32 %v330_v9, %v2806_v18 }
 0x143   :  { %3432 = vst [vmem:[#allocation11_spill] sm:$0xff] %v2812_v31  ;;  %430 = vmatmul.f32.gmra.mxu0 %v2808_v24  ;;  %v2816_v62 = vand.u32 4294901760, %v2812_v31 }
 0x144   :  { %635 = vmatmul.f32.gmra.mxu1 %v2806_v18 }
 0x145   :  { %3433 = vst [vmem:[#allocation12_spill] sm:$0xff] %v2816_v62  ;;  %v273_v29 = vpop.trf.xlu2  ;;  %v436_v34 = vsub.f32 %v2812_v31, %v2816_v62 }
 0x146   :  { %753 = vmatmul.f32.gmra.mxu2 %v2812_v31  ;;  %v333_v38 = vsel %vm316_vm3, %v273_v29, 0 }
 0x147   :  { %v2823_v19 = vand.u32 4294901760, %v333_v38  ;;  %v2825_v30 = vand.u32 4294901760, %v436_v34 }
 0x148   :  { %883 = vmatmul.f32.gmra.mxu3 %v2816_v62 }
 0x149   :  { %v2829_v49 = vsub.f32 %v333_v38, %v2823_v19 }
 0x14b   :  { %3434 = vst [vmem:[#allocation13_spill] sm:$0xff] %v2829_v49  ;;  %438 = vmatmul.f32.gmra.mxu0 %v2825_v30  ;;  %v2833_v20 = vand.u32 4294901760, %v2829_v49 }
 0x14c   :  { %639 = vmatmul.f32.gmra.mxu1 %v2823_v19 }
 0x14d   :  { %3435 = vst [vmem:[#allocation14_spill] sm:$0xff] %v2833_v20  ;;  %v274_v32 = vpop.trf.xlu2  ;;  %v444_v58 = vsub.f32 %v2829_v49, %v2833_v20 }
 0x14e   :  { %758 = vmatmul.f32.gmra.mxu2 %v2829_v49  ;;  %v336_v23 = vsel %vm316_vm3, %v274_v32, 0 }
 0x14f   :  { %v2840_v63 = vand.u32 4294901760, %v336_v23  ;;  %v2842_v27 = vand.u32 4294901760, %v444_v58 }
 0x150   :  { %889 = vmatmul.f32.gmra.mxu3 %v2833_v20 }
 0x151   :  { %v2846_v61 = vsub.f32 %v336_v23, %v2840_v63 }
 0x153   :  { %3436 = vst [vmem:[#allocation15_spill] sm:$0xff] %v2846_v61  ;;  %446 = vmatmul.f32.gmra.mxu0 %v2842_v27  ;;  %v2850_v10 = vand.u32 4294901760, %v2846_v61 }
 0x154   :  { %643 = vmatmul.f32.gmra.mxu1 %v2840_v63 }
 0x155   :  { %3437 = vst [vmem:[#allocation16_spill] sm:$0xff] %v2850_v10  ;;  %v275_v41 = vpop.trf.xlu2  ;;  %v452_v17 = vsub.f32 %v2846_v61, %v2850_v10 }
 0x156   :  { %763 = vmatmul.f32.gmra.mxu2 %v2846_v61  ;;  %v339_v36 = vsel %vm316_vm3, %v275_v41, 0 }
 0x157   :  { %v2857_v6 = vand.u32 4294901760, %v339_v36  ;;  %v2859_v56 = vand.u32 4294901760, %v452_v17 }
 0x158   :  { %895 = vmatmul.f32.gmra.mxu3 %v2850_v10 }
 0x159   :  { %v2863_v54 = vsub.f32 %v339_v36, %v2857_v6 }
 0x15b   :  { %3438 = vst [vmem:[#allocation17_spill] sm:$0xff] %v2863_v54  ;;  %454 = vmatmul.f32.gmra.mxu0 %v2859_v56  ;;  %v2867_v39 = vand.u32 4294901760, %v2863_v54 }
 0x15c   :  { %647 = vmatmul.f32.gmra.mxu1 %v2857_v6 }
 0x15d   :  { %3439 = vst [vmem:[#allocation18_spill] sm:$0xff] %v2867_v39  ;;  %v276_v48 = vpop.trf.xlu2  ;;  %v460_v12 = vsub.f32 %v2863_v54, %v2867_v39 }
 0x15e   :  { %768 = vmatmul.f32.gmra.mxu2 %v2863_v54  ;;  %v342_v46 = vsel %vm316_vm3, %v276_v48, 0 }
 0x15f   :  { %v2874_v2 = vand.u32 4294901760, %v342_v46  ;;  %v2876_v60 = vand.u32 4294901760, %v460_v12 }
 0x160   :  { %901 = vmatmul.f32.gmra.mxu3 %v2867_v39 }
 0x161   :  { %v2880_v13 = vsub.f32 %v342_v46, %v2874_v2 }
 0x163   :  { %3440 = vst [vmem:[#allocation19_spill] sm:$0xff] %v2880_v13  ;;  %462 = vmatmul.f32.gmra.mxu0 %v2876_v60  ;;  %v2884_v52 = vand.u32 4294901760, %v2880_v13 }
 0x164   :  { %651 = vmatmul.f32.gmra.mxu1 %v2874_v2 }
 0x165   :  { %3441 = vst [vmem:[#allocation20_spill] sm:$0xff] %v2884_v52  ;;  %v277_v45 = vpop.trf.xlu2  ;;  %v468_v1 = vsub.f32 %v2880_v13, %v2884_v52 }
 0x166   :  { %773 = vmatmul.f32.gmra.mxu2 %v2880_v13  ;;  %v345_v7 = vsel %vm316_vm3, %v277_v45, 0 }
 0x167   :  { %v2891_v4 = vand.u32 4294901760, %v345_v7  ;;  %v2893_v5 = vand.u32 4294901760, %v468_v1 }
 0x168   :  { %907 = vmatmul.f32.gmra.mxu3 %v2884_v52 }
 0x169   :  { %v2897_v47 = vsub.f32 %v345_v7, %v2891_v4 }
 0x16b   :  { %3442 = vst [vmem:[#allocation21_spill] sm:$0xff] %v2897_v47  ;;  %470 = vmatmul.f32.gmra.mxu0 %v2893_v5  ;;  %v2901_v42 = vand.u32 4294901760, %v2897_v47 }
 0x16c   :  { %655 = vmatmul.f32.gmra.mxu1 %v2891_v4 }
 0x16d   :  { %3443 = vst [vmem:[#allocation22_spill] sm:$0xff] %v2901_v42  ;;  %v278_v16 = vpop.trf.xlu2  ;;  %v476_v28 = vsub.f32 %v2897_v47, %v2901_v42 }
 0x16e   :  { %778 = vmatmul.f32.gmra.mxu2 %v2897_v47  ;;  %v348_v40 = vsel %vm316_vm3, %v278_v16, 0 }
 0x16f   :  { %v2908_v25 = vand.u32 4294901760, %v348_v40  ;;  %v2910_v53 = vand.u32 4294901760, %v476_v28 }
 0x170   :  { %913 = vmatmul.f32.gmra.mxu3 %v2901_v42 }
 0x171   :  { %v2914_v59 = vsub.f32 %v348_v40, %v2908_v25 }
 0x173   :  { %3444 = vst [vmem:[#allocation23_spill] sm:$0xff] %v2914_v59  ;;  %478 = vmatmul.f32.gmra.mxu0 %v2910_v53  ;;  %v2918_v3 = vand.u32 4294901760, %v2914_v59 }
 0x174   :  { %659 = vmatmul.f32.gmra.mxu1 %v2908_v25 }
 0x175   :  { %3445 = vst [vmem:[#allocation24_spill] sm:$0xff] %v2918_v3  ;;  %v279_v22 = vpop.trf.xlu2  ;;  %v484_v55 = vsub.f32 %v2914_v59, %v2918_v3 }
 0x176   :  { %783 = vmatmul.f32.gmra.mxu2 %v2914_v59  ;;  %v351_v9 = vsel %vm316_vm3, %v279_v22, 0 }
 0x177   :  { %v2925_v29 = vand.u32 4294901760, %v351_v9  ;;  %v2927_v34 = vand.u32 4294901760, %v484_v55 }
 0x178   :  { %919 = vmatmul.f32.gmra.mxu3 %v2918_v3 }
 0x179   :  { %v2931_v38 = vsub.f32 %v351_v9, %v2925_v29  ;;  %v300_v9 = vpop.trf.xlu0 }
 0x17b   :  { %3446 = vst [vmem:[#allocation25_spill] sm:$0xff] %v2931_v38  ;;  %486 = vmatmul.f32.gmra.mxu0 %v2927_v34  ;;  %v2935_v32 = vand.u32 4294901760, %v2931_v38 }
 0x17c   :  { %663 = vmatmul.f32.gmra.mxu1 %v2925_v29 }
 0x17d   :  { %3447 = vst [vmem:[#allocation26_spill] sm:$0xff] %v2935_v32  ;;  %v280_v58 = vpop.trf.xlu2  ;;  %v492_v23 = vsub.f32 %v2931_v38, %v2935_v32 }
 0x17e   :  { %788 = vmatmul.f32.gmra.mxu2 %v2931_v38  ;;  %v354_v41 = vsel %vm316_vm3, %v280_v58, 0 }
 0x17f   :  { %v2942_v17 = vand.u32 4294901760, %v354_v41  ;;  %v2944_v36 = vand.u32 4294901760, %v492_v23 }
 0x180   :  { %925 = vmatmul.f32.gmra.mxu3 %v2935_v32 }
 0x181   :  { %v2948_v48 = vsub.f32 %v354_v41, %v2942_v17 }
 0x183   :  { %3448 = vst [vmem:[#allocation27_spill] sm:$0xff] %v2948_v48  ;;  %494 = vmatmul.f32.gmra.mxu0 %v2944_v36  ;;  %v2952_v12 = vand.u32 4294901760, %v2948_v48 }
 0x184   :  { %667 = vmatmul.f32.gmra.mxu1 %v2942_v17 }
 0x185   :  { %3449 = vst [vmem:[#allocation28_spill] sm:$0xff] %v2952_v12  ;;  %v281_v46 = vpop.trf.xlu2  ;;  %v500_v45 = vsub.f32 %v2948_v48, %v2952_v12 }
 0x186   :  { %793 = vmatmul.f32.gmra.mxu2 %v2948_v48  ;;  %v357_v1 = vsel %vm316_vm3, %v281_v46, 0  ;;  %v301_v48 = vpop.trf.xlu0 }
 0x187   :  { %v2959_v7 = vand.u32 4294901760, %v357_v1  ;;  %v2961_v16 = vand.u32 4294901760, %v500_v45 }
 0x188   :  { %931 = vmatmul.f32.gmra.mxu3 %v2952_v12 }
 0x189   :  { %v2965_v28 = vsub.f32 %v357_v1, %v2959_v7 }
 0x18b   :  { %3450 = vst [vmem:[#allocation29_spill] sm:$0xff] %v2965_v28  ;;  %502 = vmatmul.f32.gmra.mxu0 %v2961_v16  ;;  %v2969_v40 = vand.u32 4294901760, %v2965_v28 }
 0x18c   :  { %671 = vmatmul.f32.gmra.mxu1 %v2959_v7 }
 0x18d   :  { %3451 = vst [vmem:[#allocation30_spill] sm:$0xff] %v2969_v40  ;;  %v282_v22 = vpop.trf.xlu2  ;;  %v508_v55 = vsub.f32 %v2965_v28, %v2969_v40 }
 0x18e   :  { %798 = vmatmul.f32.gmra.mxu2 %v2965_v28  ;;  %v360_v58 = vsel %vm316_vm3, %v282_v22, 0  ;;  %v366_v28 = vsel %vm316_vm3, %v300_v9, 0  ;;  %v302_v3 = vpop.trf.xlu0 }
 0x18f   :  { %v2976_v23 = vand.u32 4294901760, %v360_v58  ;;  %v2978_v41 = vand.u32 4294901760, %v508_v55  ;;  %v3002_v38 = vand.u32 4294901760, %v366_v28 }
 0x190   :  { %937 = vmatmul.f32.gmra.mxu3 %v2969_v40 }
 0x191   :  { %v2982_v46 = vsub.f32 %v360_v58, %v2976_v23  ;;  %v3010_v9 = vsub.f32 %v366_v28, %v3002_v38 }
 0x193   :  { %3452 = vst [vmem:[#allocation31_spill] sm:$0xff] %v2982_v46  ;;  %510 = vmatmul.f32.gmra.mxu0 %v2978_v41  ;;  %v2986_v45 = vand.u32 4294901760, %v2982_v46  ;;  %v3022_v59 = vand.u32 4294901760, %v3010_v9 }
 0x194   :  { %675 = vmatmul.f32.gmra.mxu1 %v2976_v23  ;;  %3456 = vst [vmem:[#allocation35_spill] sm:$0xff] %v3010_v9 }
 0x195   :  { %3453 = vst [vmem:[#allocation32_spill] sm:$0xff] %v2986_v45  ;;  %v283_v1 = vpop.trf.xlu2  ;;  %v516_v22 = vsub.f32 %v2982_v46, %v2986_v45 }
 0x196   :  { %803 = vmatmul.f32.gmra.mxu2 %v2982_v46  ;;  %v363_v55 = vsel %vm316_vm3, %v283_v1, 0  ;;  %3457 = vst [vmem:[#allocation36_spill] sm:$0xff] %v3022_v59 }
 0x197   :  { %v2994_v40 = vand.u32 4294901760, %v363_v55  ;;  %v2996_v58 = vand.u32 4294901760, %v516_v22 }
 0x198   :  { %943 = vmatmul.f32.gmra.mxu3 %v2986_v45 }
 0x199   :  { %v3000_v12 = vsub.f32 %v363_v55, %v2994_v40  ;;  %v369_v55 = vsel %vm316_vm3, %v301_v48, 0  ;;  %v532_v48 = vsub.f32 %v3010_v9, %v3022_v59 }
 0x19a   :  { %v3019_v32 = vand.u32 4294901760, %v369_v55 }
 0x19b   :  { %3454 = vst [vmem:[#allocation33_spill] sm:$0xff] %v3000_v12  ;;  %518 = vmatmul.f32.gmra.mxu0 %v2996_v58  ;;  %v3006_v46 = vand.u32 4294901760, %v3000_v12  ;;  %v3036_v39 = vand.u32 4294901760, %v532_v48 }
 0x19c   :  { %679 = vmatmul.f32.gmra.mxu1 %v2994_v40  ;;  %v3027_v28 = vsub.f32 %v369_v55, %v3019_v32 }
 0x19d   :  { %3455 = vst [vmem:[#allocation34_spill] sm:$0xff] %v3006_v46  ;;  %v524_v1 = vsub.f32 %v3000_v12, %v3006_v46 }
 0x19e   :  { %808 = vmatmul.f32.gmra.mxu2 %v3000_v12  ;;  %v620_v22 = vpop.f32.mrf.mxu1  ;;  %3458 = vst [vmem:[#allocation37_spill] sm:$0xff] %v3027_v28  ;;  %v3039_v55 = vand.u32 4294901760, %v3027_v28 }
 0x19f   :  { %v3016_v45 = vand.u32 4294901760, %v524_v1 }
 0x1a0   :  { %949 = vmatmul.f32.gmra.mxu3 %v3006_v46  ;;  %v372_v46 = vsel %vm316_vm3, %v302_v3, 0  ;;  %3459 = vst [vmem:[#allocation38_spill] sm:$0xff] %v3039_v55 }
 0x1a1   :  { %v3034_v54 = vand.u32 4294901760, %v372_v46 }
 0x1a3   :  { %526 = vmatmul.f32.gmra.mxu0 %v3016_v45  ;;  %v3046_v3 = vsub.f32 %v372_v46, %v3034_v54 }
 0x1a4   :  { %683 = vmatmul.f32.gmra.mxu1 %v3002_v38 }
 0x1a5   :  { %3460 = vst [vmem:[#allocation39_spill] sm:$0xff] %v3046_v3  ;;  %v3058_v46 = vand.u32 4294901760, %v3046_v3 }
 0x1a6   :  { %813 = vmatmul.f32.gmra.mxu2 %v3010_v9  ;;  %v407_v1 = vpop.f32.mrf.mxu0  ;;  %v734_v12 = vpop.f32.mrf.mxu2 }
 0x1a7   :  { %v621_v47 = vadd.f32 %v620_v22, %v407_v1  ;;  %v624_v42 = vpop.f32.mrf.mxu1  ;;  %v303_v9 = vpop.trf.xlu0  ;;  %3461 = vst [vmem:[#allocation40_spill] sm:$0xff] %v3058_v46 }
 0x1a8   :  { %955 = vmatmul.f32.gmra.mxu3 %v3022_v59  ;;  %v860_v13 = vpop.f32.mrf.mxu3 }
 0x1a9   :  { %v735_v52 = vadd.f32 %v734_v12, %v621_v47  ;;  %v540_v47 = vsub.f32 %v3027_v28, %v3039_v55  ;;  %v375_v12 = vsel %vm316_vm3, %v303_v9, 0 }
 0x1aa   :  { %v3053_v1 = vand.u32 4294901760, %v375_v12 }
 0x1ab   :  { %v3041_v61 = vadd.f32 %v860_v13, %v735_v52  ;;  %534 = vmatmul.f32.gmra.mxu0 %v3036_v39  ;;  %v3055_v59 = vand.u32 4294901760, %v540_v47 }
 0x1ac   :  { %687 = vmatmul.f32.gmra.mxu1 %v3019_v32 }
 0x1ae   :  { %818 = vmatmul.f32.gmra.mxu2 %v3027_v28  ;;  %v3065_v28 = vsub.f32 %v375_v12, %v3053_v1 }
 0x1af   :  { %v739_v22 = vpop.f32.mrf.mxu2 }
 0x1b0   :  { %961 = vmatmul.f32.gmra.mxu3 %v3039_v55  ;;  %v415_v13 = vpop.f32.mrf.mxu0  ;;  %3462 = vst [vmem:[#allocation41_spill] sm:$0xff] %v3065_v28  ;;  %v3074_v20 = vand.u32 4294901760, %v3065_v28 }
 0x1b1   :  { %v625_v52 = vadd.f32 %v624_v42, %v415_v13  ;;  %v628_v48 = vpop.f32.mrf.mxu1  ;;  %v548_v42 = vsub.f32 %v3046_v3, %v3058_v46 }
 0x1b2   :  { %v866_v10 = vpop.f32.mrf.mxu3  ;;  %3463 = vst [vmem:[#allocation42_spill] sm:$0xff] %v3074_v20 }
 0x1b3   :  { %v740_v49 = vadd.f32 %v739_v22, %v625_v52  ;;  %542 = vmatmul.f32.gmra.mxu0 %v3055_v59  ;;  %v3071_v52 = vand.u32 4294901760, %v548_v42 }
 0x1b4   :  { %691 = vmatmul.f32.gmra.mxu1 %v3034_v54 }
 0x1b5   :  { %v3062_v9 = vadd.f32 %v866_v10, %v740_v49 }
 0x1b6   :  { %823 = vmatmul.f32.gmra.mxu2 %v3046_v3  ;;  %v556_v3 = vsub.f32 %v3065_v28, %v3074_v20 }
 0x1b8   :  { %967 = vmatmul.f32.gmra.mxu3 %v3058_v46  ;;  %v423_v47 = vpop.f32.mrf.mxu0  ;;  %v3084_v31 = vand.u32 4294901760, %v556_v3 }
 0x1b9   :  { %v629_v13 = vadd.f32 %v628_v48, %v423_v47  ;;  %v632_v55 = vpop.f32.mrf.mxu1  ;;  %v744_v22 = vpop.f32.mrf.mxu2 }
 0x1bb   :  { %v745_v49 = vadd.f32 %v744_v22, %v629_v13  ;;  %v872_v10 = vpop.f32.mrf.mxu3  ;;  %550 = vmatmul.f32.gmra.mxu0 %v3071_v52 }
 0x1bc   :  { %695 = vmatmul.f32.gmra.mxu1 %v3053_v1 }
 0x1bd   :  { %v3078_v12 = vadd.f32 %v872_v10, %v745_v49 }
 0x1be   :  { %828 = vmatmul.f32.gmra.mxu2 %v3065_v28 }
 0x1c0   :  { %973 = vmatmul.f32.gmra.mxu3 %v3074_v20  ;;  %v431_v48 = vpop.f32.mrf.mxu0 }
 0x1c1   :  { %v633_v42 = vadd.f32 %v632_v55, %v431_v48  ;;  %v636_v47 = vpop.f32.mrf.mxu1  ;;  %v749_v46 = vpop.f32.mrf.mxu2 }
 0x1c3   :  { %v750_v13 = vadd.f32 %v749_v46, %v633_v42  ;;  %v878_v22 = vpop.f32.mrf.mxu3  ;;  %558 = vmatmul.f32.gmra.mxu0 %v3084_v31 }
 0x1c4   :  { %1123 = vmatmul.f32.vlgmr.msrb.gmra.mxu1 %v2702_v8 }
 0x1c5   :  { %v3088_v49 = vadd.f32 %v878_v22, %v750_v13 }
 0x1c6   :  { %1232 = vmatmul.f32.vlgmr.msrb.gmra.mxu2 %v2726_v0 }
 0x1c8   :  { %1445 = vmatmul.f32.vlgmr.msrb.gmra.mxu3 %v2702_v8  ;;  %v439_v10 = vpop.f32.mrf.mxu0 }
 0x1c9   :  { %v637_v28 = vadd.f32 %v636_v47, %v439_v10  ;;  %v640_v20 = vpop.f32.mrf.mxu1  ;;  %v754_v55 = vpop.f32.mrf.mxu2 }
 0x1cb   :  { %v755_v48 = vadd.f32 %v754_v55, %v637_v28  ;;  %v884_v62 = vpop.f32.mrf.mxu3  ;;  %1018 = vmatmul.f32.vlgmr.msrb.gmra.mxu0 %v2702_v8 }
 0x1cc   :  { %1127 = vmatmul.f32.gmra.mxu1 %v2723_v35 }
 0x1cd   :  { %v3094_v3 = vadd.f32 %v884_v62, %v755_v48 }
 0x1ce   :  { %1240 = vmatmul.f32.gmra.mxu2 %v2758_v14 }
 0x1d0   :  { %1449 = vmatmul.f32.gmra.mxu3 %v2723_v35  ;;  %v447_v46 = vpop.f32.mrf.mxu0 }
 0x1d1   :  { %v641_v0 = vadd.f32 %v640_v20, %v447_v46  ;;  %v644_v42 = vpop.f32.mrf.mxu1  ;;  %v759_v13 = vpop.f32.mrf.mxu2 }
 0x1d3   :  { %v760_v22 = vadd.f32 %v759_v13, %v641_v0  ;;  %v890_v47 = vpop.f32.mrf.mxu3  ;;  %1022 = vmatmul.f32.gmra.mxu0 %v2723_v35 }
 0x1d4   :  { %1131 = vmatmul.f32.gmra.mxu1 %v2754_v43 }
 0x1d5   :  { %v3100_v28 = vadd.f32 %v890_v47, %v760_v22 }
 0x1d6   :  { %1248 = vmatmul.f32.gmra.mxu2 %v2789_v51 }
 0x1d8   :  { %1453 = vmatmul.f32.gmra.mxu3 %v2754_v43  ;;  %v455_v62 = vpop.f32.mrf.mxu0 }
 0x1d9   :  { %v645_v14 = vadd.f32 %v644_v42, %v455_v62  ;;  %v648_v10 = vpop.f32.mrf.mxu1  ;;  %v764_v55 = vpop.f32.mrf.mxu2 }
 0x1db   :  { %v765_v48 = vadd.f32 %v764_v55, %v645_v14  ;;  %v896_v20 = vpop.f32.mrf.mxu3  ;;  %1026 = vmatmul.f32.gmra.mxu0 %v2754_v43 }
 0x1dc   :  { %1135 = vmatmul.f32.gmra.mxu1 %v2787_v37 }
 0x1dd   :  { %v3106_v46 = vadd.f32 %v896_v20, %v765_v48 }
 0x1de   :  { %1256 = vmatmul.f32.gmra.mxu2 %v2808_v24 }
 0x1e0   :  { %1457 = vmatmul.f32.gmra.mxu3 %v2787_v37  ;;  %v463_v0 = vpop.f32.mrf.mxu0 }
 0x1e1   :  { %v649_v51 = vadd.f32 %v648_v10, %v463_v0  ;;  %v652_v13 = vpop.f32.mrf.mxu1  ;;  %v769_v22 = vpop.f32.mrf.mxu2 }
 0x1e3   :  { %v770_v47 = vadd.f32 %v769_v22, %v649_v51  ;;  %v902_v42 = vpop.f32.mrf.mxu3  ;;  %1030 = vmatmul.f32.gmra.mxu0 %v2787_v37 }
 0x1e4   :  { %1139 = vmatmul.f32.gmra.mxu1 %v2806_v18 }
 0x1e5   :  { %v3112_v62 = vadd.f32 %v902_v42, %v770_v47 }
 0x1e6   :  { %1264 = vmatmul.f32.gmra.mxu2 %v2825_v30 }
 0x1e8   :  { %1461 = vmatmul.f32.gmra.mxu3 %v2806_v18  ;;  %v471_v14 = vpop.f32.mrf.mxu0 }
 0x1e9   :  { %v653_v24 = vadd.f32 %v652_v13, %v471_v14  ;;  %v656_v55 = vpop.f32.mrf.mxu1  ;;  %v774_v48 = vpop.f32.mrf.mxu2 }
 0x1eb   :  { %v775_v20 = vadd.f32 %v774_v48, %v653_v24  ;;  %v908_v10 = vpop.f32.mrf.mxu3  ;;  %1034 = vmatmul.f32.gmra.mxu0 %v2806_v18 }
 0x1ec   :  { %1143 = vmatmul.f32.gmra.mxu1 %v2823_v19 }
 0x1ed   :  { %v3118_v0 = vadd.f32 %v908_v10, %v775_v20 }
 0x1ee   :  { %1272 = vmatmul.f32.gmra.mxu2 %v2842_v27 }
 0x1f0   :  { %1465 = vmatmul.f32.gmra.mxu3 %v2823_v19  ;;  %v479_v51 = vpop.f32.mrf.mxu0 }
 0x1f1   :  { %v657_v30 = vadd.f32 %v656_v55, %v479_v51  ;;  %v660_v22 = vpop.f32.mrf.mxu1  ;;  %v779_v47 = vpop.f32.mrf.mxu2 }
 0x1f3   :  { %v780_v42 = vadd.f32 %v779_v47, %v657_v30  ;;  %v914_v13 = vpop.f32.mrf.mxu3  ;;  %1038 = vmatmul.f32.gmra.mxu0 %v2823_v19 }
 0x1f4   :  { %1147 = vmatmul.f32.gmra.mxu1 %v2840_v63 }
 0x1f5   :  { %v3124_v14 = vadd.f32 %v914_v13, %v780_v42 }
 0x1f6   :  { %1280 = vmatmul.f32.gmra.mxu2 %v2859_v56 }
 0x1f8   :  { %1469 = vmatmul.f32.gmra.mxu3 %v2840_v63  ;;  %v487_v24 = vpop.f32.mrf.mxu0 }
 0x1f9   :  { %v661_v27 = vadd.f32 %v660_v22, %v487_v24  ;;  %v664_v48 = vpop.f32.mrf.mxu1  ;;  %v784_v20 = vpop.f32.mrf.mxu2 }
 0x1fb   :  { %v785_v10 = vadd.f32 %v784_v20, %v661_v27  ;;  %v920_v55 = vpop.f32.mrf.mxu3  ;;  %1042 = vmatmul.f32.gmra.mxu0 %v2840_v63 }
 0x1fc   :  { %1151 = vmatmul.f32.gmra.mxu1 %v2857_v6 }
 0x1fd   :  { %v3130_v51 = vadd.f32 %v920_v55, %v785_v10 }
 0x1fe   :  { %1288 = vmatmul.f32.gmra.mxu2 %v2876_v60 }
 0x200   :  { %1473 = vmatmul.f32.gmra.mxu3 %v2857_v6  ;;  %v495_v30 = vpop.f32.mrf.mxu0 }
 0x201   :  { %v665_v56 = vadd.f32 %v664_v48, %v495_v30  ;;  %v668_v47 = vpop.f32.mrf.mxu1  ;;  %v789_v42 = vpop.f32.mrf.mxu2 }
 0x203   :  { %v790_v13 = vadd.f32 %v789_v42, %v665_v56  ;;  %v926_v22 = vpop.f32.mrf.mxu3  ;;  %1046 = vmatmul.f32.gmra.mxu0 %v2857_v6 }
 0x204   :  { %1155 = vmatmul.f32.gmra.mxu1 %v2874_v2 }
 0x205   :  { %v3136_v24 = vadd.f32 %v926_v22, %v790_v13 }
 0x206   :  { %1296 = vmatmul.f32.gmra.mxu2 %v2893_v5 }
 0x208   :  { %1477 = vmatmul.f32.gmra.mxu3 %v2874_v2  ;;  %v503_v27 = vpop.f32.mrf.mxu0 }
 0x209   :  { %v669_v60 = vadd.f32 %v668_v47, %v503_v27  ;;  %v672_v20 = vpop.f32.mrf.mxu1  ;;  %v794_v10 = vpop.f32.mrf.mxu2 }
 0x20b   :  { %v795_v55 = vadd.f32 %v794_v10, %v669_v60  ;;  %v932_v48 = vpop.f32.mrf.mxu3  ;;  %1050 = vmatmul.f32.gmra.mxu0 %v2874_v2 }
 0x20c   :  { %1159 = vmatmul.f32.gmra.mxu1 %v2891_v4 }
 0x20d   :  { %v3142_v30 = vadd.f32 %v932_v48, %v795_v55 }
 0x20e   :  { %1304 = vmatmul.f32.gmra.mxu2 %v2910_v53 }
 0x210   :  { %1481 = vmatmul.f32.gmra.mxu3 %v2891_v4  ;;  %v511_v56 = vpop.f32.mrf.mxu0 }
 0x211   :  { %v673_v5 = vadd.f32 %v672_v20, %v511_v56  ;;  %v676_v42 = vpop.f32.mrf.mxu1  ;;  %v799_v13 = vpop.f32.mrf.mxu2 }
 0x213   :  { %v800_v22 = vadd.f32 %v799_v13, %v673_v5  ;;  %v938_v47 = vpop.f32.mrf.mxu3  ;;  %1054 = vmatmul.f32.gmra.mxu0 %v2891_v4 }
 0x214   :  { %1163 = vmatmul.f32.gmra.mxu1 %v2908_v25 }
 0x215   :  { %v3148_v27 = vadd.f32 %v938_v47, %v800_v22 }
 0x216   :  { %1312 = vmatmul.f32.gmra.mxu2 %v2927_v34 }
 0x218   :  { %1485 = vmatmul.f32.gmra.mxu3 %v2908_v25  ;;  %v519_v60 = vpop.f32.mrf.mxu0 }
 0x219   :  { %v677_v53 = vadd.f32 %v676_v42, %v519_v60  ;;  %v680_v10 = vpop.f32.mrf.mxu1  ;;  %v804_v55 = vpop.f32.mrf.mxu2 }
 0x21b   :  { %v805_v48 = vadd.f32 %v804_v55, %v677_v53  ;;  %v944_v20 = vpop.f32.mrf.mxu3  ;;  %1058 = vmatmul.f32.gmra.mxu0 %v2908_v25 }
 0x21c   :  { %1167 = vmatmul.f32.gmra.mxu1 %v2925_v29 }
 0x21d   :  { %v3154_v56 = vadd.f32 %v944_v20, %v805_v48 }
 0x21e   :  { %1320 = vmatmul.f32.gmra.mxu2 %v2944_v36 }
 0x220   :  { %1489 = vmatmul.f32.gmra.mxu3 %v2925_v29  ;;  %v527_v5 = vpop.f32.mrf.mxu0 }
 0x221   :  { %v681_v34 = vadd.f32 %v680_v10, %v527_v5  ;;  %v684_v13 = vpop.f32.mrf.mxu1  ;;  %v809_v22 = vpop.f32.mrf.mxu2 }
 0x223   :  { %v810_v47 = vadd.f32 %v809_v22, %v681_v34  ;;  %v950_v42 = vpop.f32.mrf.mxu3  ;;  %1062 = vmatmul.f32.gmra.mxu0 %v2925_v29 }
 0x224   :  { %1171 = vmatmul.f32.gmra.mxu1 %v2942_v17 }
 0x225   :  { %v3160_v60 = vadd.f32 %v950_v42, %v810_v47 }
 0x226   :  { %1328 = vmatmul.f32.gmra.mxu2 %v2961_v16 }
 0x228   :  { %1493 = vmatmul.f32.gmra.mxu3 %v2942_v17  ;;  %v535_v53 = vpop.f32.mrf.mxu0 }
 0x229   :  { %v685_v36 = vadd.f32 %v684_v13, %v535_v53  ;;  %v688_v55 = vpop.f32.mrf.mxu1  ;;  %v814_v48 = vpop.f32.mrf.mxu2 }
 0x22b   :  { %v815_v20 = vadd.f32 %v814_v48, %v685_v36  ;;  %v956_v10 = vpop.f32.mrf.mxu3  ;;  %1066 = vmatmul.f32.gmra.mxu0 %v2942_v17 }
 0x22c   :  { %1175 = vmatmul.f32.gmra.mxu1 %v2959_v7 }
 0x22d   :  { %v3166_v5 = vadd.f32 %v956_v10, %v815_v20 }
 0x22e   :  { %1336 = vmatmul.f32.gmra.mxu2 %v2978_v41 }
 0x230   :  { %1497 = vmatmul.f32.gmra.mxu3 %v2959_v7  ;;  %v543_v34 = vpop.f32.mrf.mxu0 }
 0x231   :  { %v689_v16 = vadd.f32 %v688_v55, %v543_v34  ;;  %v692_v22 = vpop.f32.mrf.mxu1  ;;  %v819_v47 = vpop.f32.mrf.mxu2 }
 0x233   :  { %v820_v42 = vadd.f32 %v819_v47, %v689_v16  ;;  %v962_v13 = vpop.f32.mrf.mxu3  ;;  %1070 = vmatmul.f32.gmra.mxu0 %v2959_v7 }
 0x234   :  { %1179 = vmatmul.f32.gmra.mxu1 %v2976_v23 }
 0x235   :  { %v3172_v53 = vadd.f32 %v962_v13, %v820_v42 }
 0x236   :  { %1344 = vmatmul.f32.gmra.mxu2 %v2996_v58 }
 0x238   :  { %1501 = vmatmul.f32.gmra.mxu3 %v2976_v23  ;;  %v551_v36 = vpop.f32.mrf.mxu0 }
 0x239   :  { %v693_v41 = vadd.f32 %v692_v22, %v551_v36  ;;  %v696_v48 = vpop.f32.mrf.mxu1  ;;  %v824_v20 = vpop.f32.mrf.mxu2 }
 0x23b   :  { %v825_v10 = vadd.f32 %v824_v20, %v693_v41  ;;  %v968_v55 = vpop.f32.mrf.mxu3  ;;  %1074 = vmatmul.f32.gmra.mxu0 %v2976_v23 }
 0x23c   :  { %1183 = vmatmul.f32.gmra.mxu1 %v2994_v40 }
 0x23d   :  { %v3178_v34 = vadd.f32 %v968_v55, %v825_v10 }
 0x23e   :  { %1352 = vmatmul.f32.gmra.mxu2 %v3016_v45 }
 0x240   :  { %1505 = vmatmul.f32.gmra.mxu3 %v2994_v40  ;;  %v559_v16 = vpop.f32.mrf.mxu0 }
 0x241   :  { %v697_v58 = vadd.f32 %v696_v48, %v559_v16  ;;  %v829_v47 = vpop.f32.mrf.mxu2  ;;  %v1124_v42 = vpop.f32.mrf.mxu1 }
 0x243   :  { %v830_v13 = vadd.f32 %v829_v47, %v697_v58  ;;  %v974_v22 = vpop.f32.mrf.mxu3  ;;  %1078 = vmatmul.f32.gmra.mxu0 %v2994_v40 }
 0x244   :  { %1187 = vmatmul.f32.gmra.mxu1 %v3002_v38 }
 0x245   :  { %v3184_v36 = vadd.f32 %v974_v22, %v830_v13 }
 0x246   :  { %1360 = vmatmul.f32.gmra.mxu2 %v3036_v39 }
 0x248   :  { %1509 = vmatmul.f32.gmra.mxu3 %v3002_v38  ;;  %v1019_v41 = vpop.f32.mrf.mxu0 }
 0x249   :  { %v1020_v45 = vadd.f32 %v1019_v41, %v3041_v61  ;;  %v1128_v20 = vpop.f32.mrf.mxu1  ;;  %v1233_v10 = vpop.f32.mrf.mxu2 }
 0x24b   :  { %v1125_v48 = vadd.f32 %v1124_v42, %v1020_v45  ;;  %v1446_v55 = vpop.f32.mrf.mxu3  ;;  %1082 = vmatmul.f32.gmra.mxu0 %v3002_v38 }
 0x24c   :  { %v3190_v16 = vadd.f32 %v1446_v55, %v1233_v10  ;;  %1191 = vmatmul.f32.gmra.mxu1 %v3019_v32 }
 0x24d   :  { %2069 = vst [vmem:[#allocation5] sm:$0xff] %v1125_v48 }
 0x24e   :  { %1368 = vmatmul.f32.gmra.mxu2 %v3055_v59 }
 0x250   :  { %1513 = vmatmul.f32.gmra.mxu3 %v3019_v32  ;;  %v1023_v39 = vpop.f32.mrf.mxu0 }
 0x251   :  { %v1024_v58 = vadd.f32 %v1023_v39, %v3062_v9  ;;  %v1132_v47 = vpop.f32.mrf.mxu1  ;;  %v1241_v61 = vpop.f32.mrf.mxu2 }
 0x253   :  { %v1129_v13 = vadd.f32 %v1128_v20, %v1024_v58  ;;  %v1450_v22 = vpop.f32.mrf.mxu3  ;;  %1086 = vmatmul.f32.gmra.mxu0 %v3019_v32 }
 0x254   :  { %v3197_v42 = vadd.f32 %v1450_v22, %v1241_v61  ;;  %1195 = vmatmul.f32.gmra.mxu1 %v3034_v54 }
 0x255   :  { %2072 = vst [vmem:[#allocation5 + $0x10] sm:$0xff] %v1129_v13 }
 0x256   :  { %1376 = vmatmul.f32.gmra.mxu2 %v3071_v52 }
 0x258   :  { %1517 = vmatmul.f32.gmra.mxu3 %v3034_v54  ;;  %v1027_v59 = vpop.f32.mrf.mxu0 }
 0x259   :  { %v1028_v41 = vadd.f32 %v1027_v59, %v3078_v12  ;;  %v1136_v45 = vpop.f32.mrf.mxu1  ;;  %v1249_v9 = vpop.f32.mrf.mxu2 }
 0x25b   :  { %v1133_v10 = vadd.f32 %v1132_v47, %v1028_v41  ;;  %v1454_v48 = vpop.f32.mrf.mxu3  ;;  %1090 = vmatmul.f32.gmra.mxu0 %v3034_v54 }
 0x25c   :  { %v3204_v20 = vadd.f32 %v1454_v48, %v1249_v9  ;;  %1199 = vmatmul.f32.gmra.mxu1 %v3053_v1 }
 0x25d   :  { %2074 = vst [vmem:[#allocation5 + $0x20] sm:$0xff] %v1133_v10 }
 0x25e   :  { %1384 = vmatmul.f32.gmra.mxu2 %v3084_v31 }
 0x260   :  { %1521 = vmatmul.f32.gmra.mxu3 %v3053_v1  ;;  %v1031_v52 = vpop.f32.mrf.mxu0 }
 0x261   :  { %v1032_v55 = vadd.f32 %v1031_v52, %v3088_v49  ;;  %v1140_v39 = vpop.f32.mrf.mxu1  ;;  %v1257_v12 = vpop.f32.mrf.mxu2 }
 0x263   :  { %v1137_v58 = vadd.f32 %v1136_v45, %v1032_v55  ;;  %v1458_v61 = vpop.f32.mrf.mxu3  ;;  %1094 = vmatmul.f32.gmra.mxu0 %v3053_v1 }
 0x264   :  { %v3211_v47 = vadd.f32 %v1458_v61, %v1257_v12  ;;  %1685 = vmatmul.f32.vlgmr.msra.gmra.mxu1 %v2711_v26 }
 0x265   :  { %2076 = vst [vmem:[#allocation5 + $0x30] sm:$0xff] %v1137_v58 }
 0x266   :  { %1844 = vmatmul.f32.vlgmr.msra.gmra.mxu2 %v2702_v8 }
 0x268   :  { %1949 = vmatmul.f32.vlgmr.msra.gmra.mxu3 %v2702_v8  ;;  %v1035_v31 = vpop.f32.mrf.mxu0 }
 0x269   :  { %v1036_v13 = vadd.f32 %v1035_v31, %v3094_v3  ;;  %v1144_v22 = vpop.f32.mrf.mxu1  ;;  %v1265_v49 = vpop.f32.mrf.mxu2 }
 0x26b   :  { %v1141_v59 = vadd.f32 %v1140_v39, %v1036_v13  ;;  %v1462_v41 = vpop.f32.mrf.mxu3  ;;  %1559 = vmatmul.f32.vlgmr.msra.gmra.mxu0 %v2705_v21 }
 0x26c   :  { %v3218_v45 = vadd.f32 %v1462_v41, %v1265_v49  ;;  %1691 = vmatmul.f32.gmra.mxu1 %v2742_v11 }
 0x26d   :  { %2078 = vst [vmem:[#allocation5 + $0x40] sm:$0xff] %v1141_v59  ;;  %v3465_v59 = vld [vmem:[#allocation11_spill] sm:$0xff] }
 0x26e   :  { %1848 = vmatmul.f32.gmra.mxu2 %v2723_v35 }
 0x270   :  { %1953 = vmatmul.f32.gmra.mxu3 %v2723_v35  ;;  %v1039_v26 = vpop.f32.mrf.mxu0 }
 0x271   :  { %v1040_v8 = vadd.f32 %v1039_v26, %v3100_v28  ;;  %v1148_v9 = vpop.f32.mrf.mxu1  ;;  %v1273_v3 = vpop.f32.mrf.mxu2 }
 0x273   :  { %v1145_v10 = vadd.f32 %v1144_v22, %v1040_v8  ;;  %v1466_v48 = vpop.f32.mrf.mxu3  ;;  %1564 = vmatmul.f32.gmra.mxu0 %v2732_v15 }
 0x274   :  { %v3225_v52 = vadd.f32 %v1466_v48, %v1273_v3  ;;  %1697 = vmatmul.f32.gmra.mxu1 %v2774_v33 }
 0x275   :  { %2080 = vst [vmem:[#allocation5 + $0x50] sm:$0xff] %v1145_v10  ;;  %v3467_v10 = vld [vmem:[#allocation13_spill] sm:$0xff] }
 0x276   :  { %1852 = vmatmul.f32.gmra.mxu2 %v2754_v43 }
 0x278   :  { %1957 = vmatmul.f32.gmra.mxu3 %v2754_v43  ;;  %v1043_v21 = vpop.f32.mrf.mxu0 }
 0x279   :  { %v1044_v35 = vadd.f32 %v1043_v21, %v3106_v46  ;;  %v1152_v11 = vpop.f32.mrf.mxu1  ;;  %v1281_v28 = vpop.f32.mrf.mxu2  ;;  %v3468_v21 = vld [vmem:[#allocation16_spill] sm:$0xff] }
 0x27b   :  { %v1149_v55 = vadd.f32 %v1148_v9, %v1044_v35  ;;  %v1470_v39 = vpop.f32.mrf.mxu3  ;;  %1569 = vmatmul.f32.gmra.mxu0 %v2764_v57  ;;  %v3464_v57 = vld [vmem:[#allocation12_spill] sm:$0xff] }
 0x27c   :  { %v3232_v12 = vadd.f32 %v1470_v39, %v1281_v28  ;;  %1703 = vmatmul.f32.gmra.mxu1 %v2799_v50  ;;  %v3469_v39 = vld [vmem:[#allocation15_spill] sm:$0xff] }
 0x27d   :  { %2082 = vst [vmem:[#allocation5 + $0x60] sm:$0xff] %v1149_v55 }
 0x27e   :  { %1856 = vmatmul.f32.gmra.mxu2 %v2787_v37 }
 0x280   :  { %1961 = vmatmul.f32.gmra.mxu3 %v2787_v37  ;;  %v1047_v15 = vpop.f32.mrf.mxu0 }
 0x281   :  { %v1048_v43 = vadd.f32 %v1047_v15, %v3112_v62  ;;  %v1156_v33 = vpop.f32.mrf.mxu1  ;;  %v1289_v46 = vpop.f32.mrf.mxu2 }
 0x283   :  { %v1153_v58 = vadd.f32 %v1152_v11, %v1048_v43  ;;  %v1474_v61 = vpop.f32.mrf.mxu3  ;;  %1574 = vmatmul.f32.gmra.mxu0 %v2794_v44  ;;  %v3466_v44 = vld [vmem:[#allocation14_spill] sm:$0xff] }
 0x284   :  { %v3239_v31 = vadd.f32 %v1474_v61, %v1289_v46  ;;  %1709 = vmatmul.f32.gmra.mxu1 %v3464_v57  ;;  %v3470_v43 = vld [vmem:[#allocation18_spill] sm:$0xff]  ;;  %v3471_v57 = vld [vmem:[#allocation17_spill] sm:$0xff] }
 0x285   :  { %2084 = vst [vmem:[#allocation5 + $0x70] sm:$0xff] %v1153_v58 }
 0x286   :  { %1860 = vmatmul.f32.gmra.mxu2 %v2806_v18 }
 0x288   :  { %1965 = vmatmul.f32.gmra.mxu3 %v2806_v18  ;;  %v1051_v50 = vpop.f32.mrf.mxu0 }
 0x289   :  { %v1052_v37 = vadd.f32 %v1051_v50, %v3118_v0  ;;  %v1160_v13 = vpop.f32.mrf.mxu1  ;;  %v1297_v62 = vpop.f32.mrf.mxu2 }
 0x28b   :  { %v1157_v22 = vadd.f32 %v1156_v33, %v1052_v37  ;;  %v1478_v49 = vpop.f32.mrf.mxu3  ;;  %1579 = vmatmul.f32.gmra.mxu0 %v3465_v59  ;;  %v3472_v37 = vld [vmem:[#allocation20_spill] sm:$0xff]  ;;  %v3473_v59 = vld [vmem:[#allocation19_spill] sm:$0xff] }
 0x28c   :  { %v3246_v41 = vadd.f32 %v1478_v49, %v1297_v62  ;;  %1715 = vmatmul.f32.gmra.mxu1 %v3466_v44 }
 0x28d   :  { %2086 = vst [vmem:[#allocation5 + $0x80] sm:$0xff] %v1157_v22 }
 0x28e   :  { %1864 = vmatmul.f32.gmra.mxu2 %v2823_v19 }
 0x290   :  { %1969 = vmatmul.f32.gmra.mxu3 %v2823_v19  ;;  %v1055_v26 = vpop.f32.mrf.mxu0 }
 0x291   :  { %v1056_v18 = vadd.f32 %v1055_v26, %v3124_v14  ;;  %v1164_v8 = vpop.f32.mrf.mxu1  ;;  %v1305_v0 = vpop.f32.mrf.mxu2  ;;  %v3474_v26 = vld [vmem:[#allocation22_spill] sm:$0xff] }
 0x293   :  { %v1161_v9 = vadd.f32 %v1160_v13, %v1056_v18  ;;  %v1482_v3 = vpop.f32.mrf.mxu3  ;;  %1584 = vmatmul.f32.gmra.mxu0 %v3467_v10 }
 0x294   :  { %v3253_v48 = vadd.f32 %v1482_v3, %v1305_v0  ;;  %1721 = vmatmul.f32.gmra.mxu1 %v3468_v21  ;;  %v3475_v3 = vld [vmem:[#allocation21_spill] sm:$0xff]  ;;  %v3476_v21 = vld [vmem:[#allocation24_spill] sm:$0xff] }
 0x295   :  { %2088 = vst [vmem:[#allocation5 + $0x90] sm:$0xff] %v1161_v9 }
 0x296   :  { %1868 = vmatmul.f32.gmra.mxu2 %v2840_v63 }
 0x298   :  { %1973 = vmatmul.f32.gmra.mxu3 %v2840_v63  ;;  %v1059_v35 = vpop.f32.mrf.mxu0 }
 0x299   :  { %v1060_v19 = vadd.f32 %v1059_v35, %v3130_v51  ;;  %v1168_v11 = vpop.f32.mrf.mxu1  ;;  %v1313_v14 = vpop.f32.mrf.mxu2 }
 0x29b   :  { %v1165_v28 = vadd.f32 %v1164_v8, %v1060_v19  ;;  %v1486_v55 = vpop.f32.mrf.mxu3  ;;  %1589 = vmatmul.f32.gmra.mxu0 %v3469_v39  ;;  %v3478_v39 = vld [vmem:[#allocation26_spill] sm:$0xff] }
 0x29c   :  { %v3260_v15 = vadd.f32 %v1486_v55, %v1313_v14  ;;  %1727 = vmatmul.f32.gmra.mxu1 %v3470_v43 }
 0x29d   :  { %2090 = vst [vmem:[#allocation5 + $0xa0] sm:$0xff] %v1165_v28  ;;  %v3477_v28 = vld [vmem:[#allocation23_spill] sm:$0xff] }
 0x29e   :  { %1872 = vmatmul.f32.gmra.mxu2 %v2857_v6 }
 0x2a0   :  { %1977 = vmatmul.f32.gmra.mxu3 %v2857_v6  ;;  %v1063_v33 = vpop.f32.mrf.mxu0 }
 0x2a1   :  { %v1064_v63 = vadd.f32 %v1063_v33, %v3136_v24  ;;  %v1172_v46 = vpop.f32.mrf.mxu1  ;;  %v1321_v51 = vpop.f32.mrf.mxu2 }
 0x2a3   :  { %v1169_v58 = vadd.f32 %v1168_v11, %v1064_v63  ;;  %v1490_v61 = vpop.f32.mrf.mxu3  ;;  %1594 = vmatmul.f32.gmra.mxu0 %v3471_v57 }
 0x2a4   :  { %v3267_v50 = vadd.f32 %v1490_v61, %v1321_v51  ;;  %1733 = vmatmul.f32.gmra.mxu1 %v3472_v37  ;;  %v3479_v51 = vld [vmem:[#allocation25_spill] sm:$0xff]  ;;  %v3480_v61 = vld [vmem:[#allocation28_spill] sm:$0xff] }
 0x2a5   :  { %2092 = vst [vmem:[#allocation5 + $0xb0] sm:$0xff] %v1169_v58 }
 0x2a6   :  { %1876 = vmatmul.f32.gmra.mxu2 %v2874_v2 }
 0x2a8   :  { %1981 = vmatmul.f32.gmra.mxu3 %v2874_v2  ;;  %v1067_v13 = vpop.f32.mrf.mxu0 }
 0x2a9   :  { %v1068_v6 = vadd.f32 %v1067_v13, %v3142_v30  ;;  %v1176_v62 = vpop.f32.mrf.mxu1  ;;  %v1329_v24 = vpop.f32.mrf.mxu2 }
 0x2ab   :  { %v1173_v22 = vadd.f32 %v1172_v46, %v1068_v6  ;;  %v1494_v49 = vpop.f32.mrf.mxu3  ;;  %1599 = vmatmul.f32.gmra.mxu0 %v3473_v59 }
 0x2ac   :  { %v3274_v44 = vadd.f32 %v1494_v49, %v1329_v24  ;;  %1739 = vmatmul.f32.gmra.mxu1 %v3474_v26 }
 0x2ad   :  { %2094 = vst [vmem:[#allocation5 + $0xc0] sm:$0xff] %v1173_v22  ;;  %v3482_v22 = vld [vmem:[#allocation30_spill] sm:$0xff] }
 0x2ae   :  { %1880 = vmatmul.f32.gmra.mxu2 %v2891_v4 }
 0x2b0   :  { %1985 = vmatmul.f32.gmra.mxu3 %v2891_v4  ;;  %v1071_v18 = vpop.f32.mrf.mxu0 }
 0x2b1   :  { %v1072_v2 = vadd.f32 %v1071_v18, %v3148_v27  ;;  %v1180_v8 = vpop.f32.mrf.mxu1  ;;  %v1337_v30 = vpop.f32.mrf.mxu2 }
 0x2b3   :  { %v1177_v0 = vadd.f32 %v1176_v62, %v1072_v2  ;;  %v1498_v9 = vpop.f32.mrf.mxu3  ;;  %1604 = vmatmul.f32.gmra.mxu0 %v3475_v3  ;;  %v3481_v62 = vld [vmem:[#allocation27_spill] sm:$0xff]  ;;  %v3483_v2 = vld [vmem:[#allocation29_spill] sm:$0xff] }
 0x2b4   :  { %v3281_v10 = vadd.f32 %v1498_v9, %v1337_v30  ;;  %1745 = vmatmul.f32.gmra.mxu1 %v3476_v21  ;;  %v3484_v30 = vld [vmem:[#allocation32_spill] sm:$0xff] }
 0x2b5   :  { %2096 = vst [vmem:[#allocation5 + $0xd0] sm:$0xff] %v1177_v0 }
 0x2b6   :  { %1884 = vmatmul.f32.gmra.mxu2 %v2908_v25 }
 0x2b8   :  { %1989 = vmatmul.f32.gmra.mxu3 %v2908_v25  ;;  %v1075_v35 = vpop.f32.mrf.mxu0 }
 0x2b9   :  { %v1076_v4 = vadd.f32 %v1075_v35, %v3154_v56  ;;  %v1184_v19 = vpop.f32.mrf.mxu1  ;;  %v1345_v27 = vpop.f32.mrf.mxu2  ;;  %v3485_v35 = vld [vmem:[#allocation31_spill] sm:$0xff] }
 0x2bb   :  { %v1181_v11 = vadd.f32 %v1180_v8, %v1076_v4  ;;  %v1502_v14 = vpop.f32.mrf.mxu3  ;;  %1609 = vmatmul.f32.gmra.mxu0 %v3477_v28 }
 0x2bc   :  { %v3288_v55 = vadd.f32 %v1502_v14, %v1345_v27  ;;  %1751 = vmatmul.f32.gmra.mxu1 %v3478_v39  ;;  %v3487_v39 = vld [vmem:[#allocation33_spill] sm:$0xff] }
 0x2bd   :  { %2098 = vst [vmem:[#allocation5 + $0xe0] sm:$0xff] %v1181_v11 }
 0x2be   :  { %1888 = vmatmul.f32.gmra.mxu2 %v2925_v29 }
 0x2c0   :  { %1993 = vmatmul.f32.gmra.mxu3 %v2925_v29  ;;  %v1079_v43 = vpop.f32.mrf.mxu0 }
 0x2c1   :  { %v1080_v25 = vadd.f32 %v1079_v43, %v3160_v60  ;;  %v1188_v33 = vpop.f32.mrf.mxu1  ;;  %v1353_v56 = vpop.f32.mrf.mxu2 }
 0x2c3   :  { %v1185_v63 = vadd.f32 %v1184_v19, %v1080_v25  ;;  %v1506_v46 = vpop.f32.mrf.mxu3  ;;  %1614 = vmatmul.f32.gmra.mxu0 %v3479_v51  ;;  %v3486_v19 = vld [vmem:[#allocation34_spill] sm:$0xff]  ;;  %v3488_v25 = vld [vmem:[#allocation36_spill] sm:$0xff]  ;;  %v3489_v51 = vld [vmem:[#allocation35_spill] sm:$0xff] }
 0x2c4   :  { %v3295_v58 = vadd.f32 %v1506_v46, %v1353_v56  ;;  %1757 = vmatmul.f32.gmra.mxu1 %v3480_v61  ;;  %v3490_v61 = vld [vmem:[#allocation38_spill] sm:$0xff] }
 0x2c5   :  { %2100 = vst [vmem:[#allocation5 + $0xf0] sm:$0xff] %v1185_v63 }
 0x2c6   :  { %1892 = vmatmul.f32.gmra.mxu2 %v2942_v17 }
 0x2c8   :  { %1997 = vmatmul.f32.gmra.mxu3 %v2942_v17  ;;  %v1083_v57 = vpop.f32.mrf.mxu0 }
 0x2c9   :  { %v1084_v29 = vadd.f32 %v1083_v57, %v3166_v5  ;;  %v1192_v37 = vpop.f32.mrf.mxu1  ;;  %v1361_v60 = vpop.f32.mrf.mxu2 }
 0x2cb   :  { %v1189_v13 = vadd.f32 %v1188_v33, %v1084_v29  ;;  %v1510_v6 = vpop.f32.mrf.mxu3  ;;  %1619 = vmatmul.f32.gmra.mxu0 %v3481_v62  ;;  %v213_v29 = vld [vmem:[#allocation5 + $0x8] sm:$0xff] }
 0x2cc   :  { %v3302_v24 = vadd.f32 %v1510_v6, %v1361_v60  ;;  %1763 = vmatmul.f32.gmra.mxu1 %v3482_v22 }
 0x2cd   :  { %2102 = vst [vmem:[#allocation5 + $0x100] sm:$0xff] %v1189_v13 }
 0x2ce   :  { %1896 = vmatmul.f32.gmra.mxu2 %v2959_v7 }
 0x2d0   :  { %2001 = vmatmul.f32.gmra.mxu3 %v2959_v7  ;;  %v1087_v49 = vpop.f32.mrf.mxu0 }
 0x2d1   :  { %v1088_v17 = vadd.f32 %v1087_v49, %v3172_v53  ;;  %v1196_v59 = vpop.f32.mrf.mxu1  ;;  %v1369_v5 = vpop.f32.mrf.mxu2  ;;  %v3491_v49 = vld [vmem:[#allocation37_spill] sm:$0xff] }
 0x2d3   :  { %v1193_v26 = vadd.f32 %v1192_v37, %v1088_v17  ;;  %v1514_v18 = vpop.f32.mrf.mxu3  ;;  %1624 = vmatmul.f32.gmra.mxu0 %v3483_v2  ;;  %v3492_v17 = vld [vmem:[#allocation40_spill] sm:$0xff] }
 0x2d4   :  { %v3309_v8 = vadd.f32 %v1514_v18, %v1369_v5  ;;  %1769 = vmatmul.f32.gmra.mxu1 %v3484_v30  ;;  %v215_v5 = vld [vmem:[#allocation5 + $0x18] sm:$0xff] }
 0x2d5   :  { %2104 = vst [vmem:[#allocation5 + $0x110] sm:$0xff] %v1193_v26 }
 0x2d6   :  { %1900 = vmatmul.f32.gmra.mxu2 %v2976_v23 }
 0x2d8   :  { %2005 = vmatmul.f32.gmra.mxu3 %v2976_v23  ;;  %v1091_v0 = vpop.f32.mrf.mxu0 }
 0x2d9   :  { %v1092_v7 = vadd.f32 %v1091_v0, %v3178_v34  ;;  %v1200_v9 = vpop.f32.mrf.mxu1  ;;  %v1377_v53 = vpop.f32.mrf.mxu2 }
 0x2db   :  { %v1197_v3 = vadd.f32 %v1196_v59, %v1092_v7  ;;  %v1518_v21 = vpop.f32.mrf.mxu3  ;;  %1629 = vmatmul.f32.gmra.mxu0 %v3485_v35 }
 0x2dc   :  { %v3316_v4 = vadd.f32 %v1518_v21, %v1377_v53  ;;  %1775 = vmatmul.f32.gmra.mxu1 %v3486_v19  ;;  %v3494_v53 = vld [vmem:[#allocation42_spill] sm:$0xff]  ;;  %v217_v21 = vld [vmem:[#allocation5 + $0x28] sm:$0xff] }
 0x2dd   :  { %2106 = vst [vmem:[#allocation5 + $0x120] sm:$0xff] %v1197_v3 }
 0x2de   :  { %1904 = vmatmul.f32.gmra.mxu2 %v2994_v40 }
 0x2e0   :  { %2009 = vmatmul.f32.gmra.mxu3 %v2994_v40  ;;  %v1095_v27 = vpop.f32.mrf.mxu0 }
 0x2e1   :  { %v1096_v23 = vadd.f32 %v1095_v27, %v3184_v36  ;;  %v1385_v11 = vpop.f32.mrf.mxu2  ;;  %v1686_v34 = vpop.f32.mrf.mxu1 }
 0x2e3   :  { %v1201_v14 = vadd.f32 %v1200_v9, %v1096_v23  ;;  %v1522_v28 = vpop.f32.mrf.mxu3  ;;  %1634 = vmatmul.f32.gmra.mxu0 %v3487_v39  ;;  %v3493_v9 = vld [vmem:[#allocation39_spill] sm:$0xff]  ;;  %v219_v39 = vld [vmem:[#allocation5 + $0x38] sm:$0xff] }
 0x2e4   :  { %v3323_v43 = vadd.f32 %v1522_v28, %v1385_v11  ;;  %1781 = vmatmul.f32.gmra.mxu1 %v3488_v25 }
 0x2e5   :  { %2108 = vst [vmem:[#allocation5 + $0x130] sm:$0xff] %v1201_v14  ;;  %v3495_v14 = vld [vmem:[#allocation41_spill] sm:$0xff] }
 0x2e6   :  { %1908 = vmatmul.f32.gmra.mxu2 %v3002_v38 }
 0x2e8   :  { %2013 = vmatmul.f32.gmra.mxu3 %v3002_v38  ;;  %v1560_v33 = vpop.f32.mrf.mxu0 }
 0x2e9   :  { %v1561_v40 = vadd.f32 %v1560_v33, %v3190_v16  ;;  %v1692_v56 = vpop.f32.mrf.mxu1  ;;  %v1845_v36 = vpop.f32.mrf.mxu2 }
 0x2eb   :  { %v1687_v63 = vadd.f32 %v1686_v34, %v1561_v40  ;;  %v1950_v46 = vpop.f32.mrf.mxu3  ;;  %1639 = vmatmul.f32.gmra.mxu0 %v3489_v51  ;;  %v221_v51 = vld [vmem:[#allocation5 + $0x48] sm:$0xff] }
 0x2ec   :  { %1787 = vmatmul.f32.gmra.mxu1 %v3490_v61 }
 0x2ed   :  { %v1846_v57 = vadd.f32 %v1845_v36, %v1687_v63 }
 0x2ee   :  { %1912 = vmatmul.f32.gmra.mxu2 %v3019_v32 }
 0x2ef   :  { %v1951_v37 = vadd.f32 %v1950_v46, %v1846_v57 }
 0x2f0   :  { %2017 = vmatmul.f32.gmra.mxu3 %v3019_v32  ;;  %v1565_v60 = vpop.f32.mrf.mxu0 }
 0x2f1   :  { %v2030_v38 = vadd.f32 %v1951_v37, %v213_v29  ;;  %v1566_v13 = vadd.f32 %v1565_v60, %v3197_v42  ;;  %v1698_v16 = vpop.f32.mrf.mxu1  ;;  %v1849_v6 = vpop.f32.mrf.mxu2 }
 0x2f3   :  { %2071 = vst.msk [vmem:[#allocation5 + $0x8] sm:$0xff] %vm79_vm0, %v2030_v38  ;;  %v1693_v62 = vadd.f32 %v1692_v56, %v1566_v13  ;;  %v1954_v22 = vpop.f32.mrf.mxu3  ;;  %1644 = vmatmul.f32.gmra.mxu0 %v3491_v49 }
 0x2f4   :  { %1793 = vmatmul.f32.gmra.mxu1 %v3492_v17 }
 0x2f5   :  { %v1850_v59 = vadd.f32 %v1849_v6, %v1693_v62  ;;  %v223_v6 = vld [vmem:[#allocation5 + $0x58] sm:$0xff] }
 0x2f6   :  { %1916 = vmatmul.f32.gmra.mxu2 %v3034_v54 }
 0x2f7   :  { %v1955_v26 = vadd.f32 %v1954_v22, %v1850_v59 }
 0x2f8   :  { %2021 = vmatmul.f32.gmra.mxu3 %v3034_v54  ;;  %v1570_v32 = vpop.f32.mrf.mxu0 }
 0x2f9   :  { %v2032_v18 = vadd.f32 %v1955_v26, %v215_v5  ;;  %v1571_v42 = vadd.f32 %v1570_v32, %v3204_v20  ;;  %v1704_v2 = vpop.f32.mrf.mxu1  ;;  %v1853_v30 = vpop.f32.mrf.mxu2 }
 0x2fb   :  { %2073 = vst.msk [vmem:[#allocation5 + $0x18] sm:$0xff] %vm79_vm0, %v2032_v18  ;;  %v1699_v0 = vadd.f32 %v1698_v16, %v1571_v42  ;;  %v1958_v7 = vpop.f32.mrf.mxu3  ;;  %1649 = vmatmul.f32.gmra.mxu0 %v3493_v9  ;;  %v225_v18 = vld [vmem:[#allocation5 + $0x68] sm:$0xff] }
 0x2fc   :  { %1799 = vmatmul.f32.gmra.mxu1 %v3494_v53 }
 0x2fd   :  { %v1854_v3 = vadd.f32 %v1853_v30, %v1699_v0 }
 0x2fe   :  { %1920 = vmatmul.f32.gmra.mxu2 %v3053_v1 }
 0x2ff   :  { %v1959_v35 = vadd.f32 %v1958_v7, %v1854_v3 }
 0x300   :  { %2025 = vmatmul.f32.gmra.mxu3 %v3053_v1  ;;  %v1575_v54 = vpop.f32.mrf.mxu0 }
 0x301   :  { %v2034_v19 = vadd.f32 %v1959_v35, %v217_v21  ;;  %v1576_v20 = vadd.f32 %v1575_v54, %v3211_v47  ;;  %v1710_v27 = vpop.f32.mrf.mxu1  ;;  %v1857_v23 = vpop.f32.mrf.mxu2  ;;  %v227_v21 = vld [vmem:[#allocation5 + $0x78] sm:$0xff] }
 0x303   :  { %2075 = vst.msk [vmem:[#allocation5 + $0x28] sm:$0xff] %vm79_vm0, %v2034_v19  ;;  %v1705_v11 = vadd.f32 %v1704_v2, %v1576_v20  ;;  %v1962_v34 = vpop.f32.mrf.mxu3  ;;  %1654 = vmatmul.f32.gmra.mxu0 %v3495_v14  ;;  %v229_v14 = vld [vmem:[#allocation5 + $0x88] sm:$0xff] }
 0x305   :  { %v1858_v28 = vadd.f32 %v1857_v23, %v1705_v11 }
 0x307   :  { %v1963_v25 = vadd.f32 %v1962_v34, %v1858_v28 }
 0x308   :  { %v1580_v33 = vpop.f32.mrf.mxu0 }
 0x309   :  { %v2036_v40 = vadd.f32 %v1963_v25, %v219_v39  ;;  %v1581_v56 = vadd.f32 %v1580_v33, %v3218_v45  ;;  %v1716_v1 = vpop.f32.mrf.mxu1  ;;  %v1861_v36 = vpop.f32.mrf.mxu2 }
 0x30b   :  { %2077 = vst.msk [vmem:[#allocation5 + $0x38] sm:$0xff] %vm79_vm0, %v2036_v40  ;;  %v1711_v47 = vadd.f32 %v1710_v27, %v1581_v56  ;;  %v1966_v63 = vpop.f32.mrf.mxu3 }
 0x30d   :  { %v1862_v46 = vadd.f32 %v1861_v36, %v1711_v47  ;;  %v231_v47 = vld [vmem:[#allocation5 + $0x98] sm:$0xff] }
 0x30f   :  { %v1967_v61 = vadd.f32 %v1966_v63, %v1862_v46 }
 0x310   :  { %v1585_v57 = vpop.f32.mrf.mxu0 }
 0x311   :  { %v2038_v45 = vadd.f32 %v1967_v61, %v221_v51  ;;  %v1586_v29 = vadd.f32 %v1585_v57, %v3225_v52  ;;  %v1722_v37 = vpop.f32.mrf.mxu1  ;;  %v1865_v60 = vpop.f32.mrf.mxu2 }
 0x313   :  { %2079 = vst.msk [vmem:[#allocation5 + $0x48] sm:$0xff] %vm79_vm0, %v2038_v45  ;;  %v1717_v38 = vadd.f32 %v1716_v1, %v1586_v29  ;;  %v1970_v13 = vpop.f32.mrf.mxu3 }
 0x315   :  { %v1866_v16 = vadd.f32 %v1865_v60, %v1717_v38  ;;  %v233_v60 = vld [vmem:[#allocation5 + $0xa8] sm:$0xff] }
 0x317   :  { %v1971_v62 = vadd.f32 %v1970_v13, %v1866_v16 }
 0x318   :  { %v1590_v22 = vpop.f32.mrf.mxu0 }
 0x319   :  { %v2040_v49 = vadd.f32 %v1971_v62, %v223_v6  ;;  %v1591_v17 = vadd.f32 %v1590_v22, %v3232_v12  ;;  %v1728_v59 = vpop.f32.mrf.mxu1  ;;  %v1869_v5 = vpop.f32.mrf.mxu2 }
 0x31b   :  { %2081 = vst.msk [vmem:[#allocation5 + $0x58] sm:$0xff] %vm79_vm0, %v2040_v49  ;;  %v1723_v26 = vadd.f32 %v1722_v37, %v1591_v17  ;;  %v1974_v32 = vpop.f32.mrf.mxu3 }
 0x31d   :  { %v1870_v52 = vadd.f32 %v1869_v5, %v1723_v26 }
 0x31f   :  { %v1975_v42 = vadd.f32 %v1974_v32, %v1870_v52 }
 0x320   :  { %v1595_v2 = vpop.f32.mrf.mxu0 }
 0x321   :  { %v2042_v30 = vadd.f32 %v1975_v42, %v225_v18  ;;  %v1596_v0 = vadd.f32 %v1595_v2, %v3239_v31  ;;  %v1734_v7 = vpop.f32.mrf.mxu1  ;;  %v1873_v9 = vpop.f32.mrf.mxu2 }
 0x323   :  { %2083 = vst.msk [vmem:[#allocation5 + $0x68] sm:$0xff] %vm79_vm0, %v2042_v30  ;;  %v1729_v53 = vadd.f32 %v1728_v59, %v1596_v0  ;;  %v1978_v3 = vpop.f32.mrf.mxu3  ;;  %v235_v59 = vld [vmem:[#allocation5 + $0xb8] sm:$0xff]  ;;  %v237_v0 = vld [vmem:[#allocation5 + $0xc8] sm:$0xff] }
 0x325   :  { %v1874_v12 = vadd.f32 %v1873_v9, %v1729_v53 }
 0x327   :  { %v1979_v35 = vadd.f32 %v1978_v3, %v1874_v12 }
 0x328   :  { %v1600_v54 = vpop.f32.mrf.mxu0 }
 0x329   :  { %v2044_v19 = vadd.f32 %v1979_v35, %v227_v21  ;;  %v1601_v20 = vadd.f32 %v1600_v54, %v3246_v41  ;;  %v1740_v27 = vpop.f32.mrf.mxu1  ;;  %v1877_v23 = vpop.f32.mrf.mxu2 }
 0x32b   :  { %2085 = vst.msk [vmem:[#allocation5 + $0x78] sm:$0xff] %vm79_vm0, %v2044_v19  ;;  %v1735_v11 = vadd.f32 %v1734_v7, %v1601_v20  ;;  %v1982_v34 = vpop.f32.mrf.mxu3  ;;  %v239_v19 = vld [vmem:[#allocation5 + $0xd8] sm:$0xff] }
 0x32d   :  { %v1878_v31 = vadd.f32 %v1877_v23, %v1735_v11 }
 0x32f   :  { %v1983_v28 = vadd.f32 %v1982_v34, %v1878_v31 }
 0x330   :  { %v1605_v39 = vpop.f32.mrf.mxu0 }
 0x331   :  { %v2046_v25 = vadd.f32 %v1983_v28, %v229_v14  ;;  %v1606_v33 = vadd.f32 %v1605_v39, %v3253_v48  ;;  %v1746_v40 = vpop.f32.mrf.mxu1  ;;  %v1881_v56 = vpop.f32.mrf.mxu2  ;;  %v241_v39 = vld [vmem:[#allocation5 + $0xe8] sm:$0xff] }
 0x333   :  { %2087 = vst.msk [vmem:[#allocation5 + $0x88] sm:$0xff] %vm79_vm0, %v2046_v25  ;;  %v1741_v1 = vadd.f32 %v1740_v27, %v1606_v33  ;;  %v1986_v36 = vpop.f32.mrf.mxu3 }
 0x335   :  { %v1882_v41 = vadd.f32 %v1881_v56, %v1741_v1 }
 0x337   :  { %v1987_v63 = vadd.f32 %v1986_v36, %v1882_v41 }
 0x338   :  { %v1610_v46 = vpop.f32.mrf.mxu0 }
 0x339   :  { %v2048_v51 = vadd.f32 %v1987_v63, %v231_v47  ;;  %v1611_v61 = vadd.f32 %v1610_v46, %v3260_v15  ;;  %v1752_v57 = vpop.f32.mrf.mxu1  ;;  %v1885_v45 = vpop.f32.mrf.mxu2  ;;  %v243_v63 = vld [vmem:[#allocation5 + $0xf8] sm:$0xff] }
 0x33b   :  { %2089 = vst.msk [vmem:[#allocation5 + $0x98] sm:$0xff] %vm79_vm0, %v2048_v51  ;;  %v1747_v29 = vadd.f32 %v1746_v40, %v1611_v61  ;;  %v1990_v37 = vpop.f32.mrf.mxu3 }
 0x33d   :  { %v1886_v48 = vadd.f32 %v1885_v45, %v1747_v29 }
 0x33f   :  { %v1991_v38 = vadd.f32 %v1990_v37, %v1886_v48 }
 0x340   :  { %v1615_v13 = vpop.f32.mrf.mxu0 }
 0x341   :  { %v2050_v16 = vadd.f32 %v1991_v38, %v233_v60  ;;  %v1616_v6 = vadd.f32 %v1615_v13, %v3267_v50  ;;  %v1758_v62 = vpop.f32.mrf.mxu1  ;;  %v1889_v22 = vpop.f32.mrf.mxu2  ;;  %v245_v60 = vld [vmem:[#allocation5 + $0x108] sm:$0xff] }
 0x343   :  { %2091 = vst.msk [vmem:[#allocation5 + $0xa8] sm:$0xff] %vm79_vm0, %v2050_v16  ;;  %v1753_v49 = vadd.f32 %v1752_v57, %v1616_v6  ;;  %v1994_v17 = vpop.f32.mrf.mxu3 }
 0x345   :  { %v1890_v15 = vadd.f32 %v1889_v22, %v1753_v49 }
 0x347   :  { %v1995_v5 = vadd.f32 %v1994_v17, %v1890_v15 }
 0x348   :  { %v1620_v26 = vpop.f32.mrf.mxu0 }
 0x349   :  { %v2052_v32 = vadd.f32 %v1995_v5, %v235_v59  ;;  %v1621_v52 = vadd.f32 %v1620_v26, %v3274_v44  ;;  %v1764_v18 = vpop.f32.mrf.mxu1  ;;  %v1893_v42 = vpop.f32.mrf.mxu2 }
 0x34b   :  { %2093 = vst.msk [vmem:[#allocation5 + $0xb8] sm:$0xff] %vm79_vm0, %v2052_v32  ;;  %v1759_v2 = vadd.f32 %v1758_v62, %v1621_v52  ;;  %v1998_v30 = vpop.f32.mrf.mxu3 }
 0x34d   :  { %v1894_v50 = vadd.f32 %v1893_v42, %v1759_v2 }
 0x34f   :  { %v1999_v7 = vadd.f32 %v1998_v30, %v1894_v50 }
 0x350   :  { %v1625_v9 = vpop.f32.mrf.mxu0 }
 0x351   :  { %v2054_v53 = vadd.f32 %v1999_v7, %v237_v0  ;;  %v1626_v3 = vadd.f32 %v1625_v9, %v3281_v10  ;;  %v1770_v12 = vpop.f32.mrf.mxu1  ;;  %v1897_v21 = vpop.f32.mrf.mxu2 }
 0x353   :  { %2095 = vst.msk [vmem:[#allocation5 + $0xc8] sm:$0xff] %vm79_vm0, %v2054_v53  ;;  %v1765_v35 = vadd.f32 %v1764_v18, %v1626_v3  ;;  %v2002_v54 = vpop.f32.mrf.mxu3 }
 0x355   :  { %v1898_v44 = vadd.f32 %v1897_v21, %v1765_v35  ;;  %v251_v21 = vld [vmem:[#allocation5 + $0x138] sm:$0xff] }
 0x357   :  { %v2003_v20 = vadd.f32 %v2002_v54, %v1898_v44 }
 0x358   :  { %v1630_v27 = vpop.f32.mrf.mxu0 }
 0x359   :  { %v2056_v23 = vadd.f32 %v2003_v20, %v239_v19  ;;  %v1631_v11 = vadd.f32 %v1630_v27, %v3288_v55  ;;  %v1901_v34 = vpop.f32.mrf.mxu2  ;;  %v1776_v31 = vpop.f32.mrf.mxu1 }
 0x35b   :  { %2097 = vst.msk [vmem:[#allocation5 + $0xd8] sm:$0xff] %vm79_vm0, %v2056_v23  ;;  %v1771_v14 = vadd.f32 %v1770_v12, %v1631_v11  ;;  %v2006_v28 = vpop.f32.mrf.mxu3 }
 0x35d   :  { %v1902_v10 = vadd.f32 %v1901_v34, %v1771_v14 }
 0x35f   :  { %v2007_v25 = vadd.f32 %v2006_v28, %v1902_v10 }
 0x360   :  { %v1635_v33 = vpop.f32.mrf.mxu0 }
 0x361   :  { %v2058_v40 = vadd.f32 %v2007_v25, %v241_v39  ;;  %v1636_v56 = vadd.f32 %v1635_v33, %v3295_v58  ;;  %v1905_v1 = vpop.f32.mrf.mxu2  ;;  %v1782_v47 = vpop.f32.mrf.mxu1 }
 0x363   :  { %2099 = vst.msk [vmem:[#allocation5 + $0xe8] sm:$0xff] %vm79_vm0, %v2058_v40  ;;  %v1777_v36 = vadd.f32 %v1776_v31, %v1636_v56  ;;  %v2010_v41 = vpop.f32.mrf.mxu3 }
 0x365   :  { %v1906_v55 = vadd.f32 %v1905_v1, %v1777_v36 }
 0x367   :  { %v2011_v46 = vadd.f32 %v2010_v41, %v1906_v55 }
 0x368   :  { %v1640_v51 = vpop.f32.mrf.mxu0 }
 0x369   :  { %v2060_v61 = vadd.f32 %v2011_v46, %v243_v63  ;;  %v1641_v57 = vadd.f32 %v1640_v51, %v3302_v24  ;;  %v1909_v45 = vpop.f32.mrf.mxu2  ;;  %v1788_v58 = vpop.f32.mrf.mxu1  ;;  %v247_v24 = vld [vmem:[#allocation5 + $0x118] sm:$0xff] }
 0x36b   :  { %2101 = vst.msk [vmem:[#allocation5 + $0xf8] sm:$0xff] %vm79_vm0, %v2060_v61  ;;  %v1783_v29 = vadd.f32 %v1782_v47, %v1641_v57  ;;  %v2014_v37 = vpop.f32.mrf.mxu3 }
 0x36d   :  { %v1910_v48 = vadd.f32 %v1909_v45, %v1783_v29 }
 0x36f   :  { %v2015_v38 = vadd.f32 %v2014_v37, %v1910_v48 }
 0x370   :  { %v1645_v13 = vpop.f32.mrf.mxu0 }
 0x371   :  { %v2062_v16 = vadd.f32 %v2015_v38, %v245_v60  ;;  %v1646_v6 = vadd.f32 %v1645_v13, %v3309_v8  ;;  %v1913_v62 = vpop.f32.mrf.mxu2  ;;  %v1794_v59 = vpop.f32.mrf.mxu1  ;;  %v249_v8 = vld [vmem:[#allocation5 + $0x128] sm:$0xff] }
 0x373   :  { %2103 = vst.msk [vmem:[#allocation5 + $0x108] sm:$0xff] %vm79_vm0, %v2062_v16  ;;  %v1789_v22 = vadd.f32 %v1788_v58, %v1646_v6  ;;  %v2018_v49 = vpop.f32.mrf.mxu3 }
 0x375   :  { %v1914_v17 = vadd.f32 %v1913_v62, %v1789_v22 }
 0x377   :  { %v2019_v15 = vadd.f32 %v2018_v49, %v1914_v17 }
 0x378   :  { %v1650_v5 = vpop.f32.mrf.mxu0 }
 0x379   :  { %v2064_v26 = vadd.f32 %v2019_v15, %v247_v24  ;;  %v1651_v32 = vadd.f32 %v1650_v5, %v3316_v4  ;;  %v1917_v52 = vpop.f32.mrf.mxu2  ;;  %v1800_v9 = vpop.f32.mrf.mxu1 }
 0x37b   :  { %2105 = vst.msk [vmem:[#allocation5 + $0x118] sm:$0xff] %vm79_vm0, %v2064_v26  ;;  %v1795_v18 = vadd.f32 %v1794_v59, %v1651_v32  ;;  %v2022_v42 = vpop.f32.mrf.mxu3 }
 0x37d   :  { %v1918_v2 = vadd.f32 %v1917_v52, %v1795_v18 }
 0x37f   :  { %v2023_v30 = vadd.f32 %v2022_v42, %v1918_v2 }
 0x380   :  { %v1655_v50 = vpop.f32.mrf.mxu0 }
 0x381   :  { %v2066_v0 = vadd.f32 %v2023_v30, %v249_v8  ;;  %v1656_v7 = vadd.f32 %v1655_v50, %v3323_v43  ;;  %v1921_v3 = vpop.f32.mrf.mxu2 }
 0x383   :  { %2107 = vst.msk [vmem:[#allocation5 + $0x128] sm:$0xff] %vm79_vm0, %v2066_v0  ;;  %v1801_v53 = vadd.f32 %v1800_v9, %v1656_v7  ;;  %v2026_v4 = vpop.f32.mrf.mxu3 }
 0x385   :  { %v1922_v12 = vadd.f32 %v1921_v3, %v1801_v53 }
 0x387   :  { %v2027_v35 = vadd.f32 %v2026_v4, %v1922_v12 }
 0x389   :  { %v2068_v54 = vadd.f32 %v2027_v35, %v251_v21 }
 0x38b   :  { %2109 = vst.msk [vmem:[#allocation5 + $0x138] sm:$0xff] %vm79_vm0, %v2068_v54 }
 0x38c   :  { %2169 = dma.vmem_to_hbm [thread:$0]  %s2162_s11, 5120, %s2164_s14, [#allocation4], %s2289_s17, %s2289_s17, %s2290_s18  }
 0x38d   :  { %2284 = dma.done.wait [#allocation4], 5120  }
 0x38e   :  { %2285 = vsyncadd [#allocation4], 4294962176 }
 0x38f   :  { %2286 = dma.done.wait [#allocation7], 32  }
 0x390   :  { %2287 = vsyncadd [#allocation7], 4294967264 }
 0x391   :  { %2189 = vsyncpa [#allocation3], 1 }
 0x392   :  { %2190 = vsyncpa [#allocation4], 1 }
 0x393   :  { %2191 = vsyncpa [#allocation7], 1 }

</bundles_post_ra>
